<compile_context>
chip_gen: v5e
topology: v5e:2x2
jax: 0.10.0
libtpu: 0.0.40
codegen_flags: <defaults>
</compile_context>

<pallas_src>
import functools

import jax
import jax.numpy as jnp
from jax.experimental import pallas as pl
from jax.experimental.pallas import tpu as pltpu


# ------------------------------ Pallas kernel --------------------------------
def _wavenet_kernel(*refs, H, K, n_layers, dils, pads, align, has_g):
    if has_g:
        (x_ref, m_ref, g_ref, w_cat_ref, b_cat_ref, w_rs_ref, b_rs_ref,
         o_ref, xbuf, stage) = refs
    else:
        (x_ref, m_ref, w_cat_ref, b_cat_ref, w_rs_ref, b_rs_ref,
         o_ref, xbuf, stage) = refs

    Tp = x_ref.shape[-1]
    W = xbuf.shape[-1]
    KH = K * H

    # Zero only the conv halo columns (left/right of the Tp window).  Done every grid
    # step (two small dense stores, cheap) instead of pl.when(program_id==0) so the
    # result stays correct when the "parallel" batch axis is split across TensorCores
    # (each core has its own scratch and its own first iteration).
    if align > 0:
        xbuf[:, :align] = jnp.zeros((H, align), xbuf.dtype)
    if W > align + Tp:
        xbuf[:, align + Tp:] = jnp.zeros((H, W - align - Tp), xbuf.dtype)

    mask_b = jnp.broadcast_to(m_ref[0], (H, Tp))       # hoisted: reused by every layer
    x_cur = x_ref[0]                                    # (H, Tp) f32 residual state
    out_acc = jnp.zeros((H, Tp), jnp.float32)

    # initial residual state -> bf16 conv window; conditioning rows written once
    xbuf[:, align:align + Tp] = x_cur.astype(jnp.bfloat16)
    if has_g:
        stage[KH:, :] = g_ref[0].astype(jnp.bfloat16)

    for i in range(n_layers):                           # unrolled: static weights/offsets
        d, p = dils[i], pads[i]

        # stack the K shifted conv windows on the contraction (sublane) axis
        for k in range(K):
            off = align - p + k * d                     # static lane offset (>= 0)
            stage[k * H:(k + 1) * H, :] = xbuf[:, off:off + Tp]

        # fused dilated conv (H -> 2H) + conditioning 1x1: ONE bf16 MXU matmul
        x_in = jnp.dot(w_cat_ref[i], stage[...],
                       preferred_element_type=jnp.float32) + b_cat_ref[i]   # (2H,Tp) f32

        # fused_add_tanh_sigmoid_multiply; sigmoid(x) = 0.5*tanh(0.5*x)+0.5 (EUP-cheaper)
        # TODO(synk): training-mode Dropout (p_dropout > 0) not implemented (p=0 => identity).
        acts = (jnp.tanh(x_in[:H]) *
                (0.5 * jnp.tanh(0.5 * x_in[H:]) + 0.5)).astype(jnp.bfloat16)

        if i < n_layers - 1:
            rs = jnp.dot(w_rs_ref[i], acts,
                         preferred_element_type=jnp.float32) + b_rs_ref[i]      # (2H, Tp)
            x_cur = (x_cur + rs[:H]) * mask_b
            # folded refresh: masked residual goes straight into the conv window
            xbuf[:, align:align + Tp] = x_cur.astype(jnp.bfloat16)
            out_acc = out_acc + rs[H:]
        else:
            rs = jnp.dot(w_rs_ref[i, :H], acts,
                         preferred_element_type=jnp.float32) + b_rs_ref[i, :H]  # (H, Tp)
            out_acc = out_acc + rs

    o_ref[0] = (out_acc * mask_b).astype(o_ref.dtype)


def _full_spec(a):
    nd = a.ndim
    return pl.BlockSpec(a.shape, lambda b, _nd=nd: (0,) * _nd)


def wavenet_pallas(params, x, x_mask, g=None, *, kernel_size, dilation_rate):
    """x: (B, H, T) f32, x_mask: (B, 1, T) f32, g: (B, gin, T) f32 or None."""
    B, H, T = x.shape
    N = params["w_in"].shape[0]
    K = kernel_size
    dils = [dilation_rate ** i for i in range(N)]
    pads = [(K * d - d) // 2 for d in dils]
    PAD = max(pads)
    HALO = ((PAD + 127) // 128) * 128 if PAD > 0 else 0    # lane-aligned halo width
    ALIGN = HALO
    Tp = max(128, ((T + 127) // 128) * 128)                # lane-dense time axis
    W = ALIGN + Tp + HALO                                  # conv halo-buffer width

    xp = jnp.pad(x, ((0, 0), (0, 0), (0, Tp - T)))
    mp = jnp.pad(x_mask, ((0, 0), (0, 0), (0, Tp - T)))

    has_g = g is not None
    Gin = g.shape[1] if has_g else 0
    KH = K * H
    Cstk = KH + Gin

    # Repack weights so the K conv taps (+ conditioning 1x1) share one contraction:
    #   w_cat[i][o, k*H + c] = w_conv[i][o, c, k];   w_cat[i][:, K*H:] = w_cond[i]
    w_cat = jnp.transpose(params["w_in"], (0, 2, 1, 3)).reshape(N, 2 * H, KH)
    b_cat = params["b_in"]
    if has_g:
        w_cat = jnp.concatenate([w_cat, params["w_cond"]], axis=2)
        b_cat = b_cat + params["b_cond"]
    w_cat = w_cat.astype(jnp.bfloat16)                     # (N, 2H, Cstk)
    w_rs = params["w_rs"].astype(jnp.bfloat16)             # (N, 2H, H)
    b_rs = params["b_rs"]                                  # (N, 2H, 1)

    args = [xp, mp]
    in_specs = [
        pl.BlockSpec((1, H, Tp), lambda b: (b, 0, 0)),
        pl.BlockSpec((1, 1, Tp), lambda b: (b, 0, 0)),
    ]
    if has_g:
        gp = jnp.pad(g, ((0, 0), (0, 0), (0, Tp - T)))
        args.append(gp)
        in_specs.append(pl.BlockSpec((1, Gin, Tp), lambda b: (b, 0, 0)))
    # TODO(synk): mark the constant weight specs single-buffered (pipeline_mode=
    # pl.Buffered(1)) once that is relied upon; matters only at production sizes.
    args += [w_cat, b_cat, w_rs, b_rs]
    in_specs += [_full_spec(w_cat), _full_spec(b_cat),
                 _full_spec(w_rs), _full_spec(b_rs)]

    kern = functools.partial(
        _wavenet_kernel, H=H, K=K, n_layers=N,
        dils=tuple(dils), pads=tuple(pads), align=ALIGN, has_g=has_g)

    # explicit VMEM budget: double-buffered blocks + weights + scratch, 4x headroom
    blk_bytes = (H * Tp + Tp + (Gin * Tp if has_g else 0) + H * Tp) * 4
    w_bytes = (w_cat.size + w_rs.size) * 2 + (b_cat.size + b_rs.size) * 4
    scr_bytes = (H * W + Cstk * Tp) * 2
    vmem_limit = int(min(64 << 20,
                         max(16 << 20, 4 * (blk_bytes + w_bytes + scr_bytes))))

    # TODO(synk): for production T / H / n_layers, add a time-tile grid axis with a
    # max(pads)-column halo and block several batch elements per step; full-T blocks
    # are used here (they fit VMEM comfortably at these sizes).
    out = pl.pallas_call(
        kern,
        out_shape=jax.ShapeDtypeStruct((B, H, Tp), x.dtype),
        grid=(B,),
        in_specs=in_specs,
        out_specs=pl.BlockSpec((1, H, Tp), lambda b: (b, 0, 0)),
        scratch_shapes=[pltpu.VMEM((H, W), jnp.bfloat16),        # conv halo buffer
                        pltpu.VMEM((Cstk, Tp), jnp.bfloat16)],   # stacked-tap staging
        compiler_params=pltpu.CompilerParams(
            dimension_semantics=("parallel",),
            vmem_limit_bytes=vmem_limit),
    )(*args)
    return out[:, :, :T]


# ------------------------------ pure-JAX reference ---------------------------
def wavenet_ref(params, x, x_mask, g=None, *, kernel_size, dilation_rate):
    N = params["w_in"].shape[0]
    H = x.shape[1]
    K = kernel_size
    out = jnp.zeros_like(x)
    xc = x
    for i in range(N):
        d = dilation_rate ** i
        p = (K * d - d) // 2
        w = jnp.transpose(params["w_in"][i], (1, 2, 0))      # (2H, H, K)
        x_in = jax.lax.conv_general_dilated(
            xc, w, window_strides=(1,), padding=[(p, p)],
            rhs_dilation=(d,), dimension_numbers=("NCH", "OIH", "NCH"))
        x_in = x_in + params["b_in"][i][None]
        if g is not None:
            gl = jnp.einsum("oc,bct->bot", params["w_cond"][i], g) \
                 + params["b_cond"][i][None]
            x_in = x_in + gl
        acts = jnp.tanh(x_in[:, :H]) * jax.nn.sigmoid(x_in[:, H:])
        if i < N - 1:
            rs = jnp.einsum("oc,bct->bot", params["w_rs"][i], acts) \
                 + params["b_rs"][i][None]
            xc = (xc + rs[:, :H]) * x_mask
            out = out + rs[:, H:]
        else:
            rs = jnp.einsum("oc,bct->bot", params["w_rs"][i, :H], acts) \
                 + params["b_rs"][i, :H][None]
            out = out + rs
    return out * x_mask


# ------------------------------ parameter init --------------------------------
def init_params(key, hidden, kernel, n_layers, dilation_rate, gin_channels):
    H, K, N = hidden, kernel, n_layers
    keys = jax.random.split(key, 4 * N + 2)
    ki = iter(keys)

    w_in, b_in, w_rs, b_rs = [], [], [], []
    for i in range(N):
        w = 0.05 * jax.random.normal(next(ki), (2 * H, H, K), jnp.float32)
        b = 0.01 * jax.random.normal(next(ki), (2 * H,), jnp.float32)
        w_in.append(jnp.transpose(w, (2, 0, 1)))           # (K, 2H, H)
        b_in.append(b[:, None])                             # (2H, 1)
        rs_ch = H if i == N - 1 else 2 * H
        wr = 0.05 * jax.random.normal(next(ki), (rs_ch, H), jnp.float32)
        br = 0.01 * jax.random.normal(next(ki), (rs_ch,), jnp.float32)
        w_rs.append(jnp.pad(wr, ((0, 2 * H - rs_ch), (0, 0))))
        b_rs.append(jnp.pad(br, ((0, 2 * H - rs_ch),))[:, None])

    params = {
        "w_in": jnp.stack(w_in),      # (N, K, 2H, H)
        "b_in": jnp.stack(b_in),      # (N, 2H, 1)
        "w_rs": jnp.stack(w_rs),      # (N, 2H, H)  (last layer rows [H:] are zero)
        "b_rs": jnp.stack(b_rs),      # (N, 2H, 1)
    }
    if gin_channels:
        wc = 0.05 * jax.random.normal(next(ki), (2 * H * N, gin_channels), jnp.float32)
        bc = 0.01 * jax.random.normal(next(ki), (2 * H * N,), jnp.float32)
        params["w_cond"] = wc.reshape(N, 2 * H, gin_channels)
        params["b_cond"] = bc.reshape(N, 2 * H, 1)
    return params


# --------------------------------- main ---------------------------------------
if __name__ == "__main__":
    root = jax.random.PRNGKey(0)
    kp, kx, kg = jax.random.split(root, 3)

    H, K, DR, N, GIN = 32, 3, 2, 4, 16      # hidden, kernel, dilation_rate, layers, gin
    B, T = 2, 200

    params = init_params(kp, H, K, N, DR, GIN)
    x = jax.random.normal(kx, (B, H, T), jnp.float32)
    g = jax.random.normal(kg, (B, GIN, T), jnp.float32)
    lengths = jnp.array([T, T - 37])
    x_mask = (jnp.arange(T)[None, None, :] < lengths[:, None, None]).astype(jnp.float32)

    fwd = jax.jit(functools.partial(wavenet_pallas, kernel_size=K, dilation_rate=DR))
    out = fwd(params, x, x_mask, g)
    jax.block_until_ready(out)
    assert out.shape == (B, H, T)

    ref = wavenet_ref(params, x, x_mask, g, kernel_size=K, dilation_rate=DR)
    err = float(jnp.max(jnp.abs(out - ref)))
    assert err < 5e-2, f"mismatch vs reference: {err}"

    # also exercise the gin_channels == 0 (no conditioning) path
    params0 = init_params(kp, H, K, N, DR, 0)
    out0 = fwd(params0, x, x_mask, None)
    jax.block_until_ready(out0)
    ref0 = wavenet_ref(params0, x, x_mask, None, kernel_size=K, dilation_rate=DR)
    err0 = float(jnp.max(jnp.abs(out0 - ref0)))
    assert out0.shape == (B, H, T) and err0 < 5e-2, f"mismatch (no-g): {err0}"

    print("KERNEL_OK")
</pallas_src>

<mosaic_0001>
module attributes {stable_mosaic.version = 11 : i64} {
  func.func @_wavenet_kernel(%arg0: i32, %arg1: memref<1x32x256xf32, #tpu.memory_space<vmem>>, %arg2: memref<1x1x256xf32, #tpu.memory_space<vmem>>, %arg3: memref<1x16x256xf32, #tpu.memory_space<vmem>>, %arg4: memref<4x64x112xbf16, #tpu.memory_space<vmem>>, %arg5: memref<4x64x1xf32, #tpu.memory_space<vmem>>, %arg6: memref<4x64x32xbf16, #tpu.memory_space<vmem>>, %arg7: memref<4x64x1xf32, #tpu.memory_space<vmem>>, %arg8: memref<1x32x256xf32, #tpu.memory_space<vmem>>, %arg9: memref<32x512xbf16, #tpu.memory_space<vmem>>, %arg10: memref<112x256xbf16, #tpu.memory_space<vmem>>) attributes {dimension_semantics = [#tpu.dimension_semantics<parallel>], iteration_bounds = array<i64: 2>, scalar_prefetch = 0 : i64, scratch_operands = 2 : i64, tpu.core_type = #tpu.core_type<tc>, window_params = [{transform_indices = @transform_0, window_bounds = array<i64: 1, 32, 256>}, {transform_indices = @transform_1, window_bounds = array<i64: 1, 1, 256>}, {transform_indices = @transform_2, window_bounds = array<i64: 1, 16, 256>}, {pipeline_mode = #tpu.pipeline_mode<synchronous>, transform_indices = @transform_3, window_bounds = array<i64: 4, 64, 112>}, {pipeline_mode = #tpu.pipeline_mode<synchronous>, transform_indices = @transform_4, window_bounds = array<i64: 4, 64, 1>}, {pipeline_mode = #tpu.pipeline_mode<synchronous>, transform_indices = @transform_5, window_bounds = array<i64: 4, 64, 32>}, {pipeline_mode = #tpu.pipeline_mode<synchronous>, transform_indices = @transform_6, window_bounds = array<i64: 4, 64, 1>}, {transform_indices = @transform_7, window_bounds = array<i64: 1, 32, 256>}]} {
    %cst = arith.constant 0.000000e+00 : bf16
    %0 = vector.broadcast %cst : bf16 to vector<32x128xbf16>
    %c0 = arith.constant 0 : index
    %c0_0 = arith.constant 0 : index
    %1 = vector.load %arg9[%c0, %c0_0] : memref<32x512xbf16, #tpu.memory_space<vmem>>, vector<32x128xbf16>
    tpu.vector_store %arg9[%c0, %c0_0], %0 {strides = array<i32>} : memref<32x512xbf16, #tpu.memory_space<vmem>>, vector<32x128xbf16>,
    %cst_1 = arith.constant 0.000000e+00 : bf16
    %2 = vector.broadcast %cst_1 : bf16 to vector<32x128xbf16>
    %c0_2 = arith.constant 0 : index
    %c384 = arith.constant 384 : index
    %3 = vector.load %arg9[%c0_2, %c384] : memref<32x512xbf16, #tpu.memory_space<vmem>>, vector<32x128xbf16>
    tpu.vector_store %arg9[%c0_2, %c384], %2 {strides = array<i32>} : memref<32x512xbf16, #tpu.memory_space<vmem>>, vector<32x128xbf16>,
    %c0_3 = arith.constant 0 : index
    %c0_4 = arith.constant 0 : index
    %c0_5 = arith.constant 0 : index
    %4 = vector.load %arg2[%c0_3, %c0_4, %c0_5] : memref<1x1x256xf32, #tpu.memory_space<vmem>>, vector<1x1x256xf32>
    %5 = vector.shape_cast %4 : vector<1x1x256xf32> to vector<1x256xf32>
    %6 = vector.shape_cast %5 : vector<1x256xf32> to vector<1x256xf32>
    %7 = vector.broadcast %6 : vector<1x256xf32> to vector<32x256xf32>
    %c0_6 = arith.constant 0 : index
    %c0_7 = arith.constant 0 : index
    %c0_8 = arith.constant 0 : index
    %8 = vector.load %arg1[%c0_6, %c0_7, %c0_8] : memref<1x32x256xf32, #tpu.memory_space<vmem>>, vector<1x32x256xf32>
    %9 = vector.shape_cast %8 : vector<1x32x256xf32> to vector<32x256xf32>
    %cst_9 = arith.constant 0.000000e+00 : f32
    %10 = vector.broadcast %cst_9 : f32 to vector<32x256xf32>
    %11 = arith.truncf %9 : vector<32x256xf32> to vector<32x256xbf16>
    %c0_10 = arith.constant 0 : index
    %c128 = arith.constant 128 : index
    %12 = vector.load %arg9[%c0_10, %c128] : memref<32x512xbf16, #tpu.memory_space<vmem>>, vector<32x256xbf16>
    tpu.vector_store %arg9[%c0_10, %c128], %11 {strides = array<i32>} : memref<32x512xbf16, #tpu.memory_space<vmem>>, vector<32x256xbf16>,
    %c0_11 = arith.constant 0 : index
    %c0_12 = arith.constant 0 : index
    %c0_13 = arith.constant 0 : index
    %13 = vector.load %arg3[%c0_11, %c0_12, %c0_13] : memref<1x16x256xf32, #tpu.memory_space<vmem>>, vector<1x16x256xf32>
    %14 = vector.shape_cast %13 : vector<1x16x256xf32> to vector<16x256xf32>
    %15 = arith.truncf %14 : vector<16x256xf32> to vector<16x256xbf16>
    %c96 = arith.constant 96 : index
    %c0_14 = arith.constant 0 : index
    %16 = vector.load %arg10[%c96, %c0_14] : memref<112x256xbf16, #tpu.memory_space<vmem>>, vector<16x256xbf16>
    tpu.vector_store %arg10[%c96, %c0_14], %15 {strides = array<i32>} : memref<112x256xbf16, #tpu.memory_space<vmem>>, vector<16x256xbf16>,
    %c0_15 = arith.constant 0 : index
    %c127 = arith.constant 127 : index
    %17 = vector.load %arg9[%c0_15, %c127] : memref<32x512xbf16, #tpu.memory_space<vmem>>, vector<32x256xbf16>
    %c0_16 = arith.constant 0 : index
    %c0_17 = arith.constant 0 : index
    %18 = vector.load %arg10[%c0_16, %c0_17] : memref<112x256xbf16, #tpu.memory_space<vmem>>, vector<32x256xbf16>
    tpu.vector_store %arg10[%c0_16, %c0_17], %17 {strides = array<i32>} : memref<112x256xbf16, #tpu.memory_space<vmem>>, vector<32x256xbf16>,
    %c0_18 = arith.constant 0 : index
    %c128_19 = arith.constant 128 : index
    %19 = vector.load %arg9[%c0_18, %c128_19] : memref<32x512xbf16, #tpu.memory_space<vmem>>, vector<32x256xbf16>
    %c32 = arith.constant 32 : index
    %c0_20 = arith.constant 0 : index
    %20 = vector.load %arg10[%c32, %c0_20] : memref<112x256xbf16, #tpu.memory_space<vmem>>, vector<32x256xbf16>
    tpu.vector_store %arg10[%c32, %c0_20], %19 {strides = array<i32>} : memref<112x256xbf16, #tpu.memory_space<vmem>>, vector<32x256xbf16>,
    %c0_21 = arith.constant 0 : index
    %c129 = arith.constant 129 : index
    %21 = vector.load %arg9[%c0_21, %c129] : memref<32x512xbf16, #tpu.memory_space<vmem>>, vector<32x256xbf16>
    %c64 = arith.constant 64 : index
    %c0_22 = arith.constant 0 : index
    %22 = vector.load %arg10[%c64, %c0_22] : memref<112x256xbf16, #tpu.memory_space<vmem>>, vector<32x256xbf16>
    tpu.vector_store %arg10[%c64, %c0_22], %21 {strides = array<i32>} : memref<112x256xbf16, #tpu.memory_space<vmem>>, vector<32x256xbf16>,
    %c0_23 = arith.constant 0 : index
    %c0_24 = arith.constant 0 : index
    %c0_25 = arith.constant 0 : index
    %23 = vector.load %arg4[%c0_23, %c0_24, %c0_25] : memref<4x64x112xbf16, #tpu.memory_space<vmem>>, vector<1x64x112xbf16>
    %24 = vector.shape_cast %23 : vector<1x64x112xbf16> to vector<64x112xbf16>
    %c0_26 = arith.constant 0 : index
    %c0_27 = arith.constant 0 : index
    %25 = vector.load %arg10[%c0_26, %c0_27] : memref<112x256xbf16, #tpu.memory_space<vmem>>, vector<112x256xbf16>
    %cst_28 = arith.constant dense<0.000000e+00> : vector<64x256xf32>
    %26 = tpu.matmul %24, %25, %cst_28 {dimension_numbers = #tpu.dot_dimension_numbers<[1], [0], [0], [1], [0, 0, 1, 1], [], []>} : vector<64x112xbf16>, vector<112x256xbf16>, vector<64x256xf32> -> vector<64x256xf32>
    %c0_29 = arith.constant 0 : index
    %c0_30 = arith.constant 0 : index
    %c0_31 = arith.constant 0 : index
    %27 = vector.load %arg5[%c0_29, %c0_30, %c0_31] : memref<4x64x1xf32, #tpu.memory_space<vmem>>, vector<1x64x1xf32>
    %28 = vector.shape_cast %27 : vector<1x64x1xf32> to vector<64x1xf32>
    %29 = vector.broadcast %28 : vector<64x1xf32> to vector<64x256xf32>
    %30 = arith.addf %26, %29 : vector<64x256xf32>
    %31 = vector.extract_strided_slice %30 {offsets = [0, 0], sizes = [32, 256], strides = [1, 1]} : vector<64x256xf32> to vector<32x256xf32>
    %32 = math.tanh %31 : vector<32x256xf32>
    %33 = vector.extract_strided_slice %30 {offsets = [32, 0], sizes = [32, 256], strides = [1, 1]} : vector<64x256xf32> to vector<32x256xf32>
    %cst_32 = arith.constant 5.000000e-01 : f32
    %34 = vector.broadcast %cst_32 : f32 to vector<32x256xf32>
    %35 = arith.mulf %34, %33 : vector<32x256xf32>
    %36 = math.tanh %35 : vector<32x256xf32>
    %cst_33 = arith.constant 5.000000e-01 : f32
    %37 = vector.broadcast %cst_33 : f32 to vector<32x256xf32>
    %38 = arith.mulf %37, %36 : vector<32x256xf32>
    %cst_34 = arith.constant 5.000000e-01 : f32
    %39 = vector.broadcast %cst_34 : f32 to vector<32x256xf32>
    %40 = arith.addf %38, %39 : vector<32x256xf32>
    %41 = arith.mulf %32, %40 : vector<32x256xf32>
    %42 = arith.truncf %41 : vector<32x256xf32> to vector<32x256xbf16>
    %c0_35 = arith.constant 0 : index
    %c0_36 = arith.constant 0 : index
    %c0_37 = arith.constant 0 : index
    %43 = vector.load %arg6[%c0_35, %c0_36, %c0_37] : memref<4x64x32xbf16, #tpu.memory_space<vmem>>, vector<1x64x32xbf16>
    %44 = vector.shape_cast %43 : vector<1x64x32xbf16> to vector<64x32xbf16>
    %cst_38 = arith.constant dense<0.000000e+00> : vector<64x256xf32>
    %45 = tpu.matmul %44, %42, %cst_38 {dimension_numbers = #tpu.dot_dimension_numbers<[1], [0], [0], [1], [0, 0, 1, 1], [], []>} : vector<64x32xbf16>, vector<32x256xbf16>, vector<64x256xf32> -> vector<64x256xf32>
    %c0_39 = arith.constant 0 : index
    %c0_40 = arith.constant 0 : index
    %c0_41 = arith.constant 0 : index
    %46 = vector.load %arg7[%c0_39, %c0_40, %c0_41] : memref<4x64x1xf32, #tpu.memory_space<vmem>>, vector<1x64x1xf32>
    %47 = vector.shape_cast %46 : vector<1x64x1xf32> to vector<64x1xf32>
    %48 = vector.broadcast %47 : vector<64x1xf32> to vector<64x256xf32>
    %49 = arith.addf %45, %48 : vector<64x256xf32>
    %50 = vector.extract_strided_slice %49 {offsets = [0, 0], sizes = [32, 256], strides = [1, 1]} : vector<64x256xf32> to vector<32x256xf32>
    %51 = arith.addf %9, %50 : vector<32x256xf32>
    %52 = arith.mulf %51, %7 : vector<32x256xf32>
    %53 = arith.truncf %52 : vector<32x256xf32> to vector<32x256xbf16>
    %c0_42 = arith.constant 0 : index
    %c128_43 = arith.constant 128 : index
    %54 = vector.load %arg9[%c0_42, %c128_43] : memref<32x512xbf16, #tpu.memory_space<vmem>>, vector<32x256xbf16>
    tpu.vector_store %arg9[%c0_42, %c128_43], %53 {strides = array<i32>} : memref<32x512xbf16, #tpu.memory_space<vmem>>, vector<32x256xbf16>,
    %55 = vector.extract_strided_slice %49 {offsets = [32, 0], sizes = [32, 256], strides = [1, 1]} : vector<64x256xf32> to vector<32x256xf32>
    %56 = arith.addf %10, %55 : vector<32x256xf32>
    %c0_44 = arith.constant 0 : index
    %c126 = arith.constant 126 : index
    %57 = vector.load %arg9[%c0_44, %c126] : memref<32x512xbf16, #tpu.memory_space<vmem>>, vector<32x256xbf16>
    %c0_45 = arith.constant 0 : index
    %c0_46 = arith.constant 0 : index
    %58 = vector.load %arg10[%c0_45, %c0_46] : memref<112x256xbf16, #tpu.memory_space<vmem>>, vector<32x256xbf16>
    tpu.vector_store %arg10[%c0_45, %c0_46], %57 {strides = array<i32>} : memref<112x256xbf16, #tpu.memory_space<vmem>>, vector<32x256xbf16>,
    %c0_47 = arith.constant 0 : index
    %c128_48 = arith.constant 128 : index
    %59 = vector.load %arg9[%c0_47, %c128_48] : memref<32x512xbf16, #tpu.memory_space<vmem>>, vector<32x256xbf16>
    %c32_49 = arith.constant 32 : index
    %c0_50 = arith.constant 0 : index
    %60 = vector.load %arg10[%c32_49, %c0_50] : memref<112x256xbf16, #tpu.memory_space<vmem>>, vector<32x256xbf16>
    tpu.vector_store %arg10[%c32_49, %c0_50], %59 {strides = array<i32>} : memref<112x256xbf16, #tpu.memory_space<vmem>>, vector<32x256xbf16>,
    %c0_51 = arith.constant 0 : index
    %c130 = arith.constant 130 : index
    %61 = vector.load %arg9[%c0_51, %c130] : memref<32x512xbf16, #tpu.memory_space<vmem>>, vector<32x256xbf16>
    %c64_52 = arith.constant 64 : index
    %c0_53 = arith.constant 0 : index
    %62 = vector.load %arg10[%c64_52, %c0_53] : memref<112x256xbf16, #tpu.memory_space<vmem>>, vector<32x256xbf16>
    tpu.vector_store %arg10[%c64_52, %c0_53], %61 {strides = array<i32>} : memref<112x256xbf16, #tpu.memory_space<vmem>>, vector<32x256xbf16>,
    %c1 = arith.constant 1 : index
    %c0_54 = arith.constant 0 : index
    %c0_55 = arith.constant 0 : index
    %63 = vector.load %arg4[%c1, %c0_54, %c0_55] : memref<4x64x112xbf16, #tpu.memory_space<vmem>>, vector<1x64x112xbf16>
    %64 = vector.shape_cast %63 : vector<1x64x112xbf16> to vector<64x112xbf16>
    %c0_56 = arith.constant 0 : index
    %c0_57 = arith.constant 0 : index
    %65 = vector.load %arg10[%c0_56, %c0_57] : memref<112x256xbf16, #tpu.memory_space<vmem>>, vector<112x256xbf16>
    %cst_58 = arith.constant dense<0.000000e+00> : vector<64x256xf32>
    %66 = tpu.matmul %64, %65, %cst_58 {dimension_numbers = #tpu.dot_dimension_numbers<[1], [0], [0], [1], [0, 0, 1, 1], [], []>} : vector<64x112xbf16>, vector<112x256xbf16>, vector<64x256xf32> -> vector<64x256xf32>
    %c1_59 = arith.constant 1 : index
    %c0_60 = arith.constant 0 : index
    %c0_61 = arith.constant 0 : index
    %67 = vector.load %arg5[%c1_59, %c0_60, %c0_61] : memref<4x64x1xf32, #tpu.memory_space<vmem>>, vector<1x64x1xf32>
    %68 = vector.shape_cast %67 : vector<1x64x1xf32> to vector<64x1xf32>
    %69 = vector.broadcast %68 : vector<64x1xf32> to vector<64x256xf32>
    %70 = arith.addf %66, %69 : vector<64x256xf32>
    %71 = vector.extract_strided_slice %70 {offsets = [0, 0], sizes = [32, 256], strides = [1, 1]} : vector<64x256xf32> to vector<32x256xf32>
    %72 = math.tanh %71 : vector<32x256xf32>
    %73 = vector.extract_strided_slice %70 {offsets = [32, 0], sizes = [32, 256], strides = [1, 1]} : vector<64x256xf32> to vector<32x256xf32>
    %cst_62 = arith.constant 5.000000e-01 : f32
    %74 = vector.broadcast %cst_62 : f32 to vector<32x256xf32>
    %75 = arith.mulf %74, %73 : vector<32x256xf32>
    %76 = math.tanh %75 : vector<32x256xf32>
    %cst_63 = arith.constant 5.000000e-01 : f32
    %77 = vector.broadcast %cst_63 : f32 to vector<32x256xf32>
    %78 = arith.mulf %77, %76 : vector<32x256xf32>
    %cst_64 = arith.constant 5.000000e-01 : f32
    %79 = vector.broadcast %cst_64 : f32 to vector<32x256xf32>
    %80 = arith.addf %78, %79 : vector<32x256xf32>
    %81 = arith.mulf %72, %80 : vector<32x256xf32>
    %82 = arith.truncf %81 : vector<32x256xf32> to vector<32x256xbf16>
    %c1_65 = arith.constant 1 : index
    %c0_66 = arith.constant 0 : index
    %c0_67 = arith.constant 0 : index
    %83 = vector.load %arg6[%c1_65, %c0_66, %c0_67] : memref<4x64x32xbf16, #tpu.memory_space<vmem>>, vector<1x64x32xbf16>
    %84 = vector.shape_cast %83 : vector<1x64x32xbf16> to vector<64x32xbf16>
    %cst_68 = arith.constant dense<0.000000e+00> : vector<64x256xf32>
    %85 = tpu.matmul %84, %82, %cst_68 {dimension_numbers = #tpu.dot_dimension_numbers<[1], [0], [0], [1], [0, 0, 1, 1], [], []>} : vector<64x32xbf16>, vector<32x256xbf16>, vector<64x256xf32> -> vector<64x256xf32>
    %c1_69 = arith.constant 1 : index
    %c0_70 = arith.constant 0 : index
    %c0_71 = arith.constant 0 : index
    %86 = vector.load %arg7[%c1_69, %c0_70, %c0_71] : memref<4x64x1xf32, #tpu.memory_space<vmem>>, vector<1x64x1xf32>
    %87 = vector.shape_cast %86 : vector<1x64x1xf32> to vector<64x1xf32>
    %88 = vector.broadcast %87 : vector<64x1xf32> to vector<64x256xf32>
    %89 = arith.addf %85, %88 : vector<64x256xf32>
    %90 = vector.extract_strided_slice %89 {offsets = [0, 0], sizes = [32, 256], strides = [1, 1]} : vector<64x256xf32> to vector<32x256xf32>
    %91 = arith.addf %52, %90 : vector<32x256xf32>
    %92 = arith.mulf %91, %7 : vector<32x256xf32>
    %93 = arith.truncf %92 : vector<32x256xf32> to vector<32x256xbf16>
    %c0_72 = arith.constant 0 : index
    %c128_73 = arith.constant 128 : index
    %94 = vector.load %arg9[%c0_72, %c128_73] : memref<32x512xbf16, #tpu.memory_space<vmem>>, vector<32x256xbf16>
    tpu.vector_store %arg9[%c0_72, %c128_73], %93 {strides = array<i32>} : memref<32x512xbf16, #tpu.memory_space<vmem>>, vector<32x256xbf16>,
    %95 = vector.extract_strided_slice %89 {offsets = [32, 0], sizes = [32, 256], strides = [1, 1]} : vector<64x256xf32> to vector<32x256xf32>
    %96 = arith.addf %56, %95 : vector<32x256xf32>
    %c0_74 = arith.constant 0 : index
    %c124 = arith.constant 124 : index
    %97 = vector.load %arg9[%c0_74, %c124] : memref<32x512xbf16, #tpu.memory_space<vmem>>, vector<32x256xbf16>
    %c0_75 = arith.constant 0 : index
    %c0_76 = arith.constant 0 : index
    %98 = vector.load %arg10[%c0_75, %c0_76] : memref<112x256xbf16, #tpu.memory_space<vmem>>, vector<32x256xbf16>
    tpu.vector_store %arg10[%c0_75, %c0_76], %97 {strides = array<i32>} : memref<112x256xbf16, #tpu.memory_space<vmem>>, vector<32x256xbf16>,
    %c0_77 = arith.constant 0 : index
    %c128_78 = arith.constant 128 : index
    %99 = vector.load %arg9[%c0_77, %c128_78] : memref<32x512xbf16, #tpu.memory_space<vmem>>, vector<32x256xbf16>
    %c32_79 = arith.constant 32 : index
    %c0_80 = arith.constant 0 : index
    %100 = vector.load %arg10[%c32_79, %c0_80] : memref<112x256xbf16, #tpu.memory_space<vmem>>, vector<32x256xbf16>
    tpu.vector_store %arg10[%c32_79, %c0_80], %99 {strides = array<i32>} : memref<112x256xbf16, #tpu.memory_space<vmem>>, vector<32x256xbf16>,
    %c0_81 = arith.constant 0 : index
    %c132 = arith.constant 132 : index
    %101 = vector.load %arg9[%c0_81, %c132] : memref<32x512xbf16, #tpu.memory_space<vmem>>, vector<32x256xbf16>
    %c64_82 = arith.constant 64 : index
    %c0_83 = arith.constant 0 : index
    %102 = vector.load %arg10[%c64_82, %c0_83] : memref<112x256xbf16, #tpu.memory_space<vmem>>, vector<32x256xbf16>
    tpu.vector_store %arg10[%c64_82, %c0_83], %101 {strides = array<i32>} : memref<112x256xbf16, #tpu.memory_space<vmem>>, vector<32x256xbf16>,
    %c2 = arith.constant 2 : index
    %c0_84 = arith.constant 0 : index
    %c0_85 = arith.constant 0 : index
    %103 = vector.load %arg4[%c2, %c0_84, %c0_85] : memref<4x64x112xbf16, #tpu.memory_space<vmem>>, vector<1x64x112xbf16>
    %104 = vector.shape_cast %103 : vector<1x64x112xbf16> to vector<64x112xbf16>
    %c0_86 = arith.constant 0 : index
    %c0_87 = arith.constant 0 : index
    %105 = vector.load %arg10[%c0_86, %c0_87] : memref<112x256xbf16, #tpu.memory_space<vmem>>, vector<112x256xbf16>
    %cst_88 = arith.constant dense<0.000000e+00> : vector<64x256xf32>
    %106 = tpu.matmul %104, %105, %cst_88 {dimension_numbers = #tpu.dot_dimension_numbers<[1], [0], [0], [1], [0, 0, 1, 1], [], []>} : vector<64x112xbf16>, vector<112x256xbf16>, vector<64x256xf32> -> vector<64x256xf32>
    %c2_89 = arith.constant 2 : index
    %c0_90 = arith.constant 0 : index
    %c0_91 = arith.constant 0 : index
    %107 = vector.load %arg5[%c2_89, %c0_90, %c0_91] : memref<4x64x1xf32, #tpu.memory_space<vmem>>, vector<1x64x1xf32>
    %108 = vector.shape_cast %107 : vector<1x64x1xf32> to vector<64x1xf32>
    %109 = vector.broadcast %108 : vector<64x1xf32> to vector<64x256xf32>
    %110 = arith.addf %106, %109 : vector<64x256xf32>
    %111 = vector.extract_strided_slice %110 {offsets = [0, 0], sizes = [32, 256], strides = [1, 1]} : vector<64x256xf32> to vector<32x256xf32>
    %112 = math.tanh %111 : vector<32x256xf32>
    %113 = vector.extract_strided_slice %110 {offsets = [32, 0], sizes = [32, 256], strides = [1, 1]} : vector<64x256xf32> to vector<32x256xf32>
    %cst_92 = arith.constant 5.000000e-01 : f32
    %114 = vector.broadcast %cst_92 : f32 to vector<32x256xf32>
    %115 = arith.mulf %114, %113 : vector<32x256xf32>
    %116 = math.tanh %115 : vector<32x256xf32>
    %cst_93 = arith.constant 5.000000e-01 : f32
    %117 = vector.broadcast %cst_93 : f32 to vector<32x256xf32>
    %118 = arith.mulf %117, %116 : vector<32x256xf32>
    %cst_94 = arith.constant 5.000000e-01 : f32
    %119 = vector.broadcast %cst_94 : f32 to vector<32x256xf32>
    %120 = arith.addf %118, %119 : vector<32x256xf32>
    %121 = arith.mulf %112, %120 : vector<32x256xf32>
    %122 = arith.truncf %121 : vector<32x256xf32> to vector<32x256xbf16>
    %c2_95 = arith.constant 2 : index
    %c0_96 = arith.constant 0 : index
    %c0_97 = arith.constant 0 : index
    %123 = vector.load %arg6[%c2_95, %c0_96, %c0_97] : memref<4x64x32xbf16, #tpu.memory_space<vmem>>, vector<1x64x32xbf16>
    %124 = vector.shape_cast %123 : vector<1x64x32xbf16> to vector<64x32xbf16>
    %cst_98 = arith.constant dense<0.000000e+00> : vector<64x256xf32>
    %125 = tpu.matmul %124, %122, %cst_98 {dimension_numbers = #tpu.dot_dimension_numbers<[1], [0], [0], [1], [0, 0, 1, 1], [], []>} : vector<64x32xbf16>, vector<32x256xbf16>, vector<64x256xf32> -> vector<64x256xf32>
    %c2_99 = arith.constant 2 : index
    %c0_100 = arith.constant 0 : index
    %c0_101 = arith.constant 0 : index
    %126 = vector.load %arg7[%c2_99, %c0_100, %c0_101] : memref<4x64x1xf32, #tpu.memory_space<vmem>>, vector<1x64x1xf32>
    %127 = vector.shape_cast %126 : vector<1x64x1xf32> to vector<64x1xf32>
    %128 = vector.broadcast %127 : vector<64x1xf32> to vector<64x256xf32>
    %129 = arith.addf %125, %128 : vector<64x256xf32>
    %130 = vector.extract_strided_slice %129 {offsets = [0, 0], sizes = [32, 256], strides = [1, 1]} : vector<64x256xf32> to vector<32x256xf32>
    %131 = arith.addf %92, %130 : vector<32x256xf32>
    %132 = arith.mulf %131, %7 : vector<32x256xf32>
    %133 = arith.truncf %132 : vector<32x256xf32> to vector<32x256xbf16>
    %c0_102 = arith.constant 0 : index
    %c128_103 = arith.constant 128 : index
    %134 = vector.load %arg9[%c0_102, %c128_103] : memref<32x512xbf16, #tpu.memory_space<vmem>>, vector<32x256xbf16>
    tpu.vector_store %arg9[%c0_102, %c128_103], %133 {strides = array<i32>} : memref<32x512xbf16, #tpu.memory_space<vmem>>, vector<32x256xbf16>,
    %135 = vector.extract_strided_slice %129 {offsets = [32, 0], sizes = [32, 256], strides = [1, 1]} : vector<64x256xf32> to vector<32x256xf32>
    %136 = arith.addf %96, %135 : vector<32x256xf32>
    %c0_104 = arith.constant 0 : index
    %c120 = arith.constant 120 : index
    %137 = vector.load %arg9[%c0_104, %c120] : memref<32x512xbf16, #tpu.memory_space<vmem>>, vector<32x256xbf16>
    %c0_105 = arith.constant 0 : index
    %c0_106 = arith.constant 0 : index
    %138 = vector.load %arg10[%c0_105, %c0_106] : memref<112x256xbf16, #tpu.memory_space<vmem>>, vector<32x256xbf16>
    tpu.vector_store %arg10[%c0_105, %c0_106], %137 {strides = array<i32>} : memref<112x256xbf16, #tpu.memory_space<vmem>>, vector<32x256xbf16>,
    %c0_107 = arith.constant 0 : index
    %c128_108 = arith.constant 128 : index
    %139 = vector.load %arg9[%c0_107, %c128_108] : memref<32x512xbf16, #tpu.memory_space<vmem>>, vector<32x256xbf16>
    %c32_109 = arith.constant 32 : index
    %c0_110 = arith.constant 0 : index
    %140 = vector.load %arg10[%c32_109, %c0_110] : memref<112x256xbf16, #tpu.memory_space<vmem>>, vector<32x256xbf16>
    tpu.vector_store %arg10[%c32_109, %c0_110], %139 {strides = array<i32>} : memref<112x256xbf16, #tpu.memory_space<vmem>>, vector<32x256xbf16>,
    %c0_111 = arith.constant 0 : index
    %c136 = arith.constant 136 : index
    %141 = vector.load %arg9[%c0_111, %c136] : memref<32x512xbf16, #tpu.memory_space<vmem>>, vector<32x256xbf16>
    %c64_112 = arith.constant 64 : index
    %c0_113 = arith.constant 0 : index
    %142 = vector.load %arg10[%c64_112, %c0_113] : memref<112x256xbf16, #tpu.memory_space<vmem>>, vector<32x256xbf16>
    tpu.vector_store %arg10[%c64_112, %c0_113], %141 {strides = array<i32>} : memref<112x256xbf16, #tpu.memory_space<vmem>>, vector<32x256xbf16>,
    %c3 = arith.constant 3 : index
    %c0_114 = arith.constant 0 : index
    %c0_115 = arith.constant 0 : index
    %143 = vector.load %arg4[%c3, %c0_114, %c0_115] : memref<4x64x112xbf16, #tpu.memory_space<vmem>>, vector<1x64x112xbf16>
    %144 = vector.shape_cast %143 : vector<1x64x112xbf16> to vector<64x112xbf16>
    %c0_116 = arith.constant 0 : index
    %c0_117 = arith.constant 0 : index
    %145 = vector.load %arg10[%c0_116, %c0_117] : memref<112x256xbf16, #tpu.memory_space<vmem>>, vector<112x256xbf16>
    %cst_118 = arith.constant dense<0.000000e+00> : vector<64x256xf32>
    %146 = tpu.matmul %144, %145, %cst_118 {dimension_numbers = #tpu.dot_dimension_numbers<[1], [0], [0], [1], [0, 0, 1, 1], [], []>} : vector<64x112xbf16>, vector<112x256xbf16>, vector<64x256xf32> -> vector<64x256xf32>
    %c3_119 = arith.constant 3 : index
    %c0_120 = arith.constant 0 : index
    %c0_121 = arith.constant 0 : index
    %147 = vector.load %arg5[%c3_119, %c0_120, %c0_121] : memref<4x64x1xf32, #tpu.memory_space<vmem>>, vector<1x64x1xf32>
    %148 = vector.shape_cast %147 : vector<1x64x1xf32> to vector<64x1xf32>
    %149 = vector.broadcast %148 : vector<64x1xf32> to vector<64x256xf32>
    %150 = arith.addf %146, %149 : vector<64x256xf32>
    %151 = vector.extract_strided_slice %150 {offsets = [0, 0], sizes = [32, 256], strides = [1, 1]} : vector<64x256xf32> to vector<32x256xf32>
    %152 = math.tanh %151 : vector<32x256xf32>
    %153 = vector.extract_strided_slice %150 {offsets = [32, 0], sizes = [32, 256], strides = [1, 1]} : vector<64x256xf32> to vector<32x256xf32>
    %cst_122 = arith.constant 5.000000e-01 : f32
    %154 = vector.broadcast %cst_122 : f32 to vector<32x256xf32>
    %155 = arith.mulf %154, %153 : vector<32x256xf32>
    %156 = math.tanh %155 : vector<32x256xf32>
    %cst_123 = arith.constant 5.000000e-01 : f32
    %157 = vector.broadcast %cst_123 : f32 to vector<32x256xf32>
    %158 = arith.mulf %157, %156 : vector<32x256xf32>
    %cst_124 = arith.constant 5.000000e-01 : f32
    %159 = vector.broadcast %cst_124 : f32 to vector<32x256xf32>
    %160 = arith.addf %158, %159 : vector<32x256xf32>
    %161 = arith.mulf %152, %160 : vector<32x256xf32>
    %162 = arith.truncf %161 : vector<32x256xf32> to vector<32x256xbf16>
    %c3_125 = arith.constant 3 : index
    %c0_126 = arith.constant 0 : index
    %c0_127 = arith.constant 0 : index
    %163 = vector.load %arg6[%c3_125, %c0_126, %c0_127] : memref<4x64x32xbf16, #tpu.memory_space<vmem>>, vector<1x32x32xbf16>
    %164 = vector.shape_cast %163 : vector<1x32x32xbf16> to vector<32x32xbf16>
    %cst_128 = arith.constant dense<0.000000e+00> : vector<32x256xf32>
    %165 = tpu.matmul %164, %162, %cst_128 {dimension_numbers = #tpu.dot_dimension_numbers<[1], [0], [0], [1], [0, 0, 1, 1], [], []>} : vector<32x32xbf16>, vector<32x256xbf16>, vector<32x256xf32> -> vector<32x256xf32>
    %c3_129 = arith.constant 3 : index
    %c0_130 = arith.constant 0 : index
    %c0_131 = arith.constant 0 : index
    %166 = vector.load %arg7[%c3_129, %c0_130, %c0_131] : memref<4x64x1xf32, #tpu.memory_space<vmem>>, vector<1x32x1xf32>
    %167 = vector.shape_cast %166 : vector<1x32x1xf32> to vector<32x1xf32>
    %168 = vector.broadcast %167 : vector<32x1xf32> to vector<32x256xf32>
    %169 = arith.addf %165, %168 : vector<32x256xf32>
    %170 = arith.addf %136, %169 : vector<32x256xf32>
    %171 = arith.mulf %170, %7 : vector<32x256xf32>
    %c0_132 = arith.constant 0 : index
    %c0_133 = arith.constant 0 : index
    %c0_134 = arith.constant 0 : index
    %172 = vector.load %arg8[%c0_132, %c0_133, %c0_134] : memref<1x32x256xf32, #tpu.memory_space<vmem>>, vector<1x32x256xf32>
    %173 = vector.shape_cast %172 : vector<1x32x256xf32> to vector<32x256xf32>
    %174 = vector.shape_cast %171 : vector<32x256xf32> to vector<1x32x256xf32>
    tpu.vector_store %arg8[%c0_132, %c0_133, %c0_134], %174 {strides = array<i32>} : memref<1x32x256xf32, #tpu.memory_space<vmem>>, vector<1x32x256xf32>,
    return
  }
  func.func @transform_0(%arg0: i32) -> (i32, i32, i32) {
    %c0_i32 = arith.constant 0 : i32
    %c0_i32_0 = arith.constant 0 : i32
    %c0_i32_1 = arith.constant 0 : i32
    return %arg0, %c0_i32, %c0_i32_0 : i32, i32, i32
  }
  func.func @transform_1(%arg0: i32) -> (i32, i32, i32) {
    %c0_i32 = arith.constant 0 : i32
    %c0_i32_0 = arith.constant 0 : i32
    %c0_i32_1 = arith.constant 0 : i32
    return %arg0, %c0_i32, %c0_i32_0 : i32, i32, i32
  }
  func.func @transform_2(%arg0: i32) -> (i32, i32, i32) {
    %c0_i32 = arith.constant 0 : i32
    %c0_i32_0 = arith.constant 0 : i32
    %c0_i32_1 = arith.constant 0 : i32
    return %arg0, %c0_i32, %c0_i32_0 : i32, i32, i32
  }
  func.func @transform_3(%arg0: i32) -> (i32, i32, i32) {
    %c0_i32 = arith.constant 0 : i32
    %c0_i32_0 = arith.constant 0 : i32
    %c0_i32_1 = arith.constant 0 : i32
    %c0_i32_2 = arith.constant 0 : i32
    return %c0_i32, %c0_i32_0, %c0_i32_1 : i32, i32, i32
  }
  func.func @transform_4(%arg0: i32) -> (i32, i32, i32) {
    %c0_i32 = arith.constant 0 : i32
    %c0_i32_0 = arith.constant 0 : i32
    %c0_i32_1 = arith.constant 0 : i32
    %c0_i32_2 = arith.constant 0 : i32
    return %c0_i32, %c0_i32_0, %c0_i32_1 : i32, i32, i32
  }
  func.func @transform_5(%arg0: i32) -> (i32, i32, i32) {
    %c0_i32 = arith.constant 0 : i32
    %c0_i32_0 = arith.constant 0 : i32
    %c0_i32_1 = arith.constant 0 : i32
    %c0_i32_2 = arith.constant 0 : i32
    return %c0_i32, %c0_i32_0, %c0_i32_1 : i32, i32, i32
  }
  func.func @transform_6(%arg0: i32) -> (i32, i32, i32) {
    %c0_i32 = arith.constant 0 : i32
    %c0_i32_0 = arith.constant 0 : i32
    %c0_i32_1 = arith.constant 0 : i32
    %c0_i32_2 = arith.constant 0 : i32
    return %c0_i32, %c0_i32_0, %c0_i32_1 : i32, i32, i32
  }
  func.func @transform_7(%arg0: i32) -> (i32, i32, i32) {
    %c0_i32 = arith.constant 0 : i32
    %c0_i32_0 = arith.constant 0 : i32
    %c0_i32_1 = arith.constant 0 : i32
    return %arg0, %c0_i32, %c0_i32_0 : i32, i32, i32
  }
}

</mosaic_0001>

<bundles_post_ra>
// kernel: wavenet_pallas.1
= control target key start
LH: loop header
LB: loop body
LE: loop exit
PB: predicated region body
PF: predicated region fallthrough
CT: control target
= control target key end

     0   :  { %12 = vsyncpa [#allocation5], 0  ;;  %s4390_s0 = inlined_call_operand.vmem [shape: f32[2,32,256], index: 0, kind: input, shape index: {}]   ;;  %s4391_s1 = inlined_call_operand.vmem [shape: f32[2,1,256], index: 1, kind: input, shape index: {}]   ;;  %s4392_s2 = inlined_call_operand.vmem [shape: f32[2,16,256], index: 2, kind: input, shape index: {}]   ;;  %s4393_s3 = inlined_call_operand.vmem [shape: bf16[4,64,112], index: 3, kind: input, shape index: {}]   ;;  %s4394_s4 = inlined_call_operand.vmem [shape: f32[4,64,1], index: 4, kind: input, shape index: {}]   ;;  %s4395_s5 = inlined_call_operand.vmem [shape: bf16[4,64,32], index: 5, kind: input, shape index: {}]   ;;  %s4396_s6 = inlined_call_operand.vmem [shape: f32[4,64,1], index: 6, kind: input, shape index: {}]   ;;  %s4397_s7 = inlined_call_operand.hbm [shape: f32[2,32,256], index: 7, kind: output, shape index: {}]  }
   0x1   :  { %14 = vsyncpa [#allocation5 + $0x1], 0  ;;  %s3658_s24 = smov 0   ;;  %s3660_s25 = smov 0  }
   0x2   :  { %s3662_s26 = smov 0   ;;  %s3664_s27 = smov 0  }
   0x3 LB: > { %s3679_s28 = sadd.s32 4294967295, %s3605_s27   ;;  %s2726_s29 = sadd.s32 4294967294, %s3605_s27   ;;  %s3605_s27 = sphi %s3664_s27, %s4403_s27   ;;  %s3601_s26 = sphi %s3662_s26, %s4402_s26   ;;  %s3597_s25 = sphi %s3660_s25, %s4401_s25   ;;  %s3593_s24 = sphi %s3658_s24, %s4400_s24  }
   0x4   : > { %s3683_s30 = sadd.s32 1, %s3605_s27   ;;  %s189_s8 = sadd.s32 1, %s3601_s26 }
   0x5   : > { %s186_s9 = ssub.s32 %s3605_s27, %s3683_s30  ;;  %p199_p0 = scmp.ne.s32.totalorder %s3601_s26, %s3597_s25 }
   0x6   : > { %p187_p1 = scmp.eq.s32.totalorder %s186_s9, 0  ;;  %p200_p2 = scmp.eq.s32.totalorder %s3679_s28, 1 }
   0x7   : > { %p205_p3 = scmp.ne.s32.totalorder %s3597_s25, %s3593_s24  ;;  %p206_p4 = scmp.eq.s32.totalorder %s2726_s29, 1 }
   0x8   : > { %s3694_s10 = scalar_select %p187_p1, %s3601_s26, %s189_s8  }
   0x9   : > { %p3696_p5 = por %p200_p2, %p199_p0  ;;  %p3700_p6 = por %p206_p4, %p205_p3 }
   0xa   : > { %p2729_p7 = scmp.ge.s32.totalorder %s3605_s27, 1  ;;  %p259_p8 = scmp.lt.s32.totalorder %s3605_s27, 3 }
   0xc   : > { %p260_p9 = pnand %p2729_p7, %p259_p8 }
   0xd   : > { %p300_p10 = scmp.lt.s32.totalorder (!%p260_p9), %s3679_s28, 1  ;;  %s3608_s18 = smov (!%p260_p9), 127  }
   0xe   : > { %263 = sbr.rel (%p260_p9) target bundleno = 2150 (0x866), region = 48  ;;  %s3609_s19 = smov (!%p260_p9), 1  }
   0xf   : > { %s3610_s21 = smov (!%p260_p9), 126   ;;  %s3321_s29 = sshll.u32 (!%p260_p9), %s3679_s28, 6 }
  0x10   : > { %s2636_s9 = scalar_lea.hbm (!%p260_p9), %s4397_s7, %s3321_s29 }
  0x11   : > { %s2639_s15 = sshll.u32 (!%p260_p9), %s2636_s9, 4  ;;  %s2640_s15 = int_to_ptr.hbm [resolvable:$true] %s2639_s15 }
  0x12   : > { %s3557_s16 = sshra.s32 (!%p260_p9), %s2640_s15, 4  ;;  %s3558_s16 = int_to_ptr.hbm [resolvable:$true] %s3557_s16 }
  0x13   : > { %v3607_v0 = vmov 0   ;;  %s3708_s13 = scalar_select %p300_p10, %s3679_s28, 1  ;;  %vm393_vm0 = vcmask 1043456   ;;  %vm460_vm1 = vcmask 1039360   ;;  %vm395_vm2 = vcmask 7168  }
  0x14   : > { %321 = vst [vmem:[#allocation2 + $0x2c] sm:$0xf] %v3607_v0  ;;  %3384 = vset.pattern.permute.xlu1 %v3607_v0  ;;  %3383 = vset.pattern.permute.xlu0 %v3607_v0  ;;  %vm636_vm3 = vcmask 916480   ;;  %vm835_vm4 = vcmask 261120   ;;  %vm1044_vm5 = vcmask 1031168   ;;  %vm979_vm6 = vcmask 15360   ;;  %p3564_p0 = scmp.lt.s32.totalorder %s3558_s16, %s4397_s7 }
  0x15   : > { %322 = vst [vmem:[#allocation2 + $0x3c] sm:$0xf] %v3607_v0  ;;  %3382 = vset.pattern.permute.xlu2 %v3607_v0  ;;  %s3233_s14 = sshll.u32 %s3708_s13, 6  ;;  %s3234_s20 = sshll.u32 %s3708_s13, 5  ;;  %vm1630_vm7 = vcmask 1014784   ;;  %vm1565_vm8 = vcmask 31744  }
  0x16   : > { %315 = vst [vmem:[#allocation2] sm:$0xf] %v3607_v0  ;;  %s304_s17 = scalar_lea.vmem %s4390_s0, %s3233_s14  ;;  %s313_s23 = scalar_lea.vmem %s4392_s2, %s3234_s20  ;;  %vm2216_vm9 = vcmask 982016   ;;  %vm2151_vm10 = vcmask 64512  }
  0x17   : > { %316 = vst [vmem:[#allocation2 + $0x10] sm:$0xf] %v3607_v0  ;;  %v3714_v1 = vld [vmem:[%s304_s17 + $0x30] sm:$0xff]  ;;  %v3716_v2 = vld [vmem:[%s304_s17 + $0x38] sm:$0xff]  ;;  %v3720_v4 = vld [vmem:[%s304_s17 + $0x20] sm:$0xff]  ;;  %s2733_s22 = sshll.u32 %s3708_s13, 1 }
  0x18   : > { %317 = vst [vmem:[#allocation2 + $0x20] sm:$0xf] %v3607_v0  ;;  %v340_v3 = vpack.c.bf16 %v3716_v2, %v3714_v1  ;;  %v3722_v5 = vld [vmem:[%s304_s17 + $0x28] sm:$0xff]  ;;  %v3726_v8 = vld [vmem:[%s304_s17] sm:$0xff]  ;;  %v3732_v12 = vld [vmem:[%s304_s17 + $0x10] sm:$0xff]  ;;  %s308_s8 = scalar_lea.vmem %s4391_s1, %s2733_s22  ;;  %s3611_s13 = smov 2  }
  0x19   : > { %318 = vst [vmem:[#allocation2 + $0x30] sm:$0xf] %v3607_v0  ;;  %v339_v7 = vpack.c.bf16 %v3722_v5, %v3720_v4  ;;  %v3728_v9 = vld [vmem:[%s304_s17 + $0x8] sm:$0xff]  ;;  %v3734_v13 = vld [vmem:[%s304_s17 + $0x18] sm:$0xff]  ;;  %v345_v27 = vld [vmem:[%s313_s23] sm:$0xff]  ;;  %s3615_s14 = smov 8  }
  0x1a   : > { %319 = vst [vmem:[#allocation2 + $0xc] sm:$0xf] %v3607_v0  ;;  %447 = vrot.lane.b32.xlu1 %v340_v3, %s3608_s18  ;;  %v337_v11 = vpack.c.bf16 %v3728_v9, %v3726_v8  ;;  %v338_v15 = vpack.c.bf16 %v3734_v13, %v3732_v12  ;;  %v346_v28 = vld [vmem:[%s313_s23 + $0x8] sm:$0xff]  ;;  %v347_v29 = vld [vmem:[%s313_s23 + $0x10] sm:$0xff]  ;;  %v348_v30 = vld [vmem:[%s313_s23 + $0x18] sm:$0xff]  ;;  %s3559_s17 = scalar_lea.hbm %s3558_s16, 64 }
  0x1b   : > { %v424_v6 = vld [vmem:[#allocation2 + $0x2c] sm:$0xf]  ;;  %320 = vst [vmem:[#allocation2 + $0x1c] sm:$0xf] %v3607_v0  ;;  %v349_v31 = vpack.c.bf16 %v346_v28, %v345_v27  ;;  %v350_v32 = vpack.c.bf16 %v348_v30, %v347_v29  ;;  %p3560_p11 = scmp.ne.s32.totalorder %s3558_s16, %s3559_s17  ;;  %s3563_s20 = scalar_lea.hbm %s4397_s7, 128 }
  0x1c   : > { %v426_v10 = vld [vmem:[#allocation2 + $0x3c] sm:$0xf]  ;;  %344 = vst [vmem:[#allocation2 + $0x34] sm:$0xff] %v340_v3  ;;  %p3565_p1 = scmp.lt.s32.totalorder %s3563_s20, %s3559_s17 }
  0x1d   : > { %v3372_v14 = vpack.i.bf16 %v426_v10, %v424_v6  ;;  %343 = vst [vmem:[#allocation2 + $0x24] sm:$0xff] %v339_v7  ;;  %p3561_p12 = pnand %p3560_p11, %p3696_p5 }
  0x1e   : > { %341 = vst [vmem:[#allocation2 + $0x4] sm:$0xff] %v337_v11  ;;  %p3566_p2 = por %p3565_p1, %p3564_p0 }
  0x1f   : > { %3373 = vrot.lane.b32.xlu0 %v3372_v14, %s3608_s18  ;;  %342 = vst [vmem:[#allocation2 + $0x14] sm:$0xff] %v338_v15  ;;  %p3562_p13 = pneg %p3561_p12 }
  0x20   : > { %417 = vst [vmem:[#allocation3 + $0x30] sm:$0xff] %v339_v7 }
  0x21   : > { %v420_v16 = vld [vmem:[#allocation2 + $0xc] sm:$0xf]  ;;  %418 = vst [vmem:[#allocation3 + $0x38] sm:$0xff] %v340_v3  ;;  %p3567_p3 = pnand %p3566_p2, %p3562_p13 }
  0x22   : > { %v422_v17 = vld [vmem:[#allocation2 + $0x1c] sm:$0xf]  ;;  %415 = vst [vmem:[#allocation3 + $0x20] sm:$0xff] %v337_v11  ;;  %435 = vrot.lane.b32.xlu1 %v337_v11, %s3608_s18 }
  0x23   : > { %v3377_v18 = vpack.i.bf16 %v422_v17, %v420_v16  ;;  %416 = vst [vmem:[#allocation3 + $0x28] sm:$0xff] %v338_v15  ;;  %v359_v22 = vld [vmem:[#allocation2 + $0x30] sm:$0xff]  ;;  %v360_v23 = vld [vmem:[#allocation2 + $0x38] sm:$0xf]  ;;  %v502_v16 = vld [vmem:[%s4394_s4 + $0x20] sm:$0xff] }
  0x24   : > { %v358_v19 = vld [vmem:[#allocation2 + $0x28] sm:$0xf]  ;;  %v357_v20 = vld [vmem:[#allocation2 + $0x20] sm:$0xff]  ;;  %351 = vst [vmem:[#allocation3 + $0x60] sm:$0xff] %v349_v31 }
  0x25   : > { %3378 = vrot.lane.b32.xlu2 %v3377_v18, %s3608_s18  ;;  %v353_v21 = vld [vmem:[#allocation2] sm:$0xff]  ;;  %v354_v25 = vld [vmem:[#allocation2 + $0x8] sm:$0xf]  ;;  %352 = vst [vmem:[#allocation3 + $0x68] sm:$0xff] %v350_v32 }
  0x26   : > { %v356_v24 = vld [vmem:[#allocation2 + $0x18] sm:$0xf]  ;;  %v355_v26 = vld [vmem:[#allocation2 + $0x10] sm:$0xff] }
  0x27   : > { %443 = vrot.lane.b32.xlu0 %v339_v7, %s3608_s18 }
  0x2a   : > { %379 = vrot.lane.b32.xlu1 %v358_v19, %s3609_s19 }
  0x2b   : > { %v2802_v34 = vld [vmem:[#allocation3 + $0x60] sm:$0xf]  ;;  %v3251_v35 = vld [vmem:[#allocation3 + $0x64] sm:$0xf] }
  0x2c   : > { %v3252_v37 = vld [vmem:[#allocation3 + $0x64] sm:$0xf0]  ;;  %v2804_v38 = vld [vmem:[#allocation3 + $0x68] sm:$0xf0] }
  0x2d   : > { %439 = vrot.lane.b32.xlu2 %v338_v15, %s3608_s18  ;;  %v2803_v39 = vor.u32 %v3252_v37, %v2802_v34  ;;  %v2807_v40 = vor.u32 %v3251_v35, %v2804_v38  ;;  %v505_v15 = vld [vmem:[%s4394_s4 + $0x38] sm:$0xff]  ;;  %v3245_v37 = vld [vmem:[#allocation3 + $0x34] sm:$0xf] }
  0x2e   : > { %v2780_v38 = vld [vmem:[#allocation3 + $0x38] sm:$0xf0] }
  0x2f   : > { %377 = vrot.lane.b32.xlu0 %v357_v20, %s3609_s19  ;;  %650 = vmatpush.bf16.msra.mxu0 %v2803_v39 }
  0x30   : > { %679 = vmatpush.bf16.msra.mxu1 %v2807_v40 }
  0x32   : > { %369 = vrot.lane.b32.xlu1 %v353_v21, %s3609_s19 }
  0x35   : > { %381 = vrot.lane.b32.xlu2 %v359_v22, %s3609_s19 }
  0x37   : > { %383 = vrot.lane.b32.xlu0 %v360_v23, %s3609_s19 }
  0x3a   : > { %375 = vrot.lane.b32.xlu1 %v356_v24, %s3609_s19 }
  0x3d   : > { %371 = vrot.lane.b32.xlu2 %v354_v25, %s3609_s19 }
  0x3f   : > { %373 = vrot.lane.b32.xlu0 %v355_v26, %s3609_s19 }
  0x42   : > { %528 = vperm.xlu1 %3384, %v502_v16  }
  0x47   : > { %543 = vperm.xlu0 %3383, %v505_v15  }
  0x7f   : > { %v3379_v33 = vpop.permute.xlu2 %3378 }
  0x80   : > { %v3381_v36 = vunpack.i.h.bf16 %v3379_v33  ;;  %v3380_v48 = vunpack.i.l.bf16 %v3379_v33  ;;  %v2778_v33 = vld [vmem:[#allocation3 + $0x30] sm:$0xf] }
  0x82   : > { %v454_v41 = vrot.slane %v3381_v36, 4  ;;  %v452_v52 = vrot.slane %v3380_v48, 4  ;;  %v3246_v36 = vld [vmem:[#allocation3 + $0x34] sm:$0xf0]  ;;  %v2770_v48 = vld [vmem:[#allocation3 + $0x20] sm:$0xf] }
  0x87   : > { %v440_v42 = vpop.permute.xlu2 %439 }
  0x88   : > { %v453_v43 = vrot.slane %v440_v42, 4 }
  0x8a   : > { %v462_v44 = vsel %vm393_vm0, %v453_v43, %v454_v41  ;;  %v498_v43 = vld [vmem:[%s4394_s4] sm:$0xff] }
  0x8b   : > { %v463_v45 = vsel %vm460_vm1, %v440_v42, %v462_v44  ;;  %v500_v44 = vld [vmem:[%s4394_s4 + $0x10] sm:$0xff]  ;;  %508 = vperm.xlu0 %3383, %v498_v43  }
  0x8c   : > { %473 = vst [vmem:[#allocation3 + $0x48] sm:$0xff] %v463_v45  ;;  %v448_v46 = vpop.permute.xlu1 %447  ;;  %518 = vperm.xlu1 %3384, %v500_v44  }
  0x8d   : > { %v457_v51 = vrot.slane %v448_v46, 4 }
  0x8f   : > { %v382_v58 = vpop.permute.xlu2 %381 }
  0x90   : > { %v391_v32 = vrot.slane %v382_v58, 4 }
  0x91   : > { %v3374_v47 = vpop.permute.xlu0 %3373 }
  0x92   : > { %v3376_v49 = vunpack.i.h.bf16 %v3374_v47  ;;  %v3375_v53 = vunpack.i.l.bf16 %v3374_v47  ;;  %v2783_v47 = vor.u32 %v3245_v37, %v2780_v38 }
  0x93   : > { %v3248_v26 = vld [vmem:[#allocation3 + $0x44] sm:$0xf0]  ;;  %v2788_v27 = vld [vmem:[#allocation3 + $0x48] sm:$0xf0] }
  0x94   : > { %v458_v50 = vrot.slane %v3376_v49, 4  ;;  %v436_v55 = vpop.permute.xlu1 %435  ;;  %v456_v61 = vrot.slane %v3375_v53, 4 }
  0x95   : > { %v451_v57 = vrot.slane %v436_v55, 4 }
  0x96   : > { %v466_v54 = vsel %vm393_vm0, %v457_v51, %v458_v50  ;;  %v3244_v50 = vld [vmem:[#allocation3 + $0x24] sm:$0xf0]  ;;  %v3243_v51 = vld [vmem:[#allocation3 + $0x24] sm:$0xf] }
  0x97   : > { %v467_v56 = vsel %vm460_vm1, %v448_v46, %v466_v54  ;;  %v459_v60 = vsel %vm393_vm0, %v451_v57, %v452_v52  ;;  %v372_v11 = vpop.permute.xlu2 %371  ;;  %v2779_v46 = vor.u32 %v3246_v36, %v2778_v33  ;;  %v2772_v52 = vld [vmem:[#allocation3 + $0x28] sm:$0xf0]  ;;  %v2771_v54 = vor.u32 %v3244_v50, %v2770_v48 }
  0x98   : > { %475 = vst [vmem:[#allocation3 + $0x58] sm:$0xff] %v467_v56  ;;  %v461_v63 = vsel %vm460_vm1, %v436_v55, %v459_v60  ;;  %v386_v19 = vrot.slane %v372_v11, 4  ;;  %v2775_v55 = vor.u32 %v3243_v51, %v2772_v52  ;;  %v499_v60 = vld [vmem:[%s4394_s4 + $0x8] sm:$0xff] }
  0x99   : > { %v444_v59 = vpop.permute.xlu0 %443  ;;  %472 = vst [vmem:[#allocation3 + $0x40] sm:$0xff] %v461_v63  ;;  %513 = vperm.xlu1 %3384, %v499_v60  }
  0x9a   : > { %v455_v62 = vrot.slane %v444_v59, 4 }
  0x9c   : > { %v464_v0 = vsel %vm393_vm0, %v455_v62, %v456_v61  ;;  %v380_v6 = vpop.permute.xlu1 %379 }
  0x9d   : > { %v465_v3 = vsel %vm460_vm1, %v444_v59, %v464_v0  ;;  %v390_v7 = vrot.slane %v380_v6, 4 }
  0x9e   : > { %474 = vst [vmem:[#allocation3 + $0x50] sm:$0xff] %v465_v3 }
  0x9f   : > { %v3250_v18 = vld [vmem:[#allocation3 + $0x54] sm:$0xf0]  ;;  %v2796_v22 = vld [vmem:[#allocation3 + $0x58] sm:$0xf0] }
  0xa0   : > { %v2786_v29 = vld [vmem:[#allocation3 + $0x40] sm:$0xf]  ;;  %v3247_v30 = vld [vmem:[#allocation3 + $0x44] sm:$0xf] }
  0xa1   : > { %v378_v10 = vpop.permute.xlu0 %377  ;;  %v2787_v40 = vor.u32 %v3248_v26, %v2786_v29  ;;  %v2791_v41 = vor.u32 %v3247_v30, %v2788_v27  ;;  %v769_v26 = vld [vmem:[%s4396_s6 + $0x10] sm:$0xff]  ;;  %v768_v27 = vld [vmem:[%s4396_s6 + $0x8] sm:$0xff] }
  0xa2   : > { %v389_v14 = vrot.slane %v378_v10, 4 }
  0xa4   : > { %v399_v17 = vsel %vm393_vm0, %v389_v14, %v390_v7  ;;  %v370_v28 = vpop.permute.xlu1 %369 }
  0xa5   : > { %v2794_v20 = vld [vmem:[#allocation3 + $0x50] sm:$0xf]  ;;  %v3249_v21 = vld [vmem:[#allocation3 + $0x54] sm:$0xf]  ;;  %v400_v23 = vsel %vm395_vm2, %v378_v10, %v399_v17  ;;  %v385_v31 = vrot.slane %v370_v28, 4 }
  0xa6   : > { %v2795_v24 = vor.u32 %v3250_v18, %v2794_v20  ;;  %v2799_v25 = vor.u32 %v3249_v21, %v2796_v22  ;;  %409 = vst [vmem:[#allocation3 + $0x10] sm:$0xff] %v400_v23  ;;  %v3235_v18 = vld [vmem:[%s4393_s3] sm:$0xff]  ;;  %v3236_v20 = vld [vmem:[%s4393_s3 + $0x8] sm:$0xff]  ;;  %v770_v23 = vld [vmem:[%s4396_s6 + $0x18] sm:$0xff] }
  0xa7   : > { %v394_v35 = vsel %vm393_vm0, %v385_v31, %v386_v19  ;;  %v504_v19 = vld [vmem:[%s4394_s4 + $0x30] sm:$0xff]  ;;  %v503_v21 = vld [vmem:[%s4394_s4 + $0x28] sm:$0xff]  ;;  %v767_v22 = vld [vmem:[%s4396_s6] sm:$0xff]  ;;  %792 = vperm.xlu0 %3383, %v770_v23  }
  0xa8   : > { %651 = vmatpush.bf16.msra.mxu0 %v2795_v24  ;;  %680 = vmatpush.bf16.msra.mxu1 %v2799_v25  ;;  %v396_v42 = vsel %vm395_vm2, %v370_v28, %v394_v35  ;;  %v501_v24 = vld [vmem:[%s4394_s4 + $0x18] sm:$0xff]  ;;  %v3237_v25 = vld [vmem:[%s4393_s3 + $0x10] sm:$0xff] }
  0xa9   : > { %v384_v34 = vpop.permute.xlu0 %383  ;;  %407 = vst [vmem:[#allocation3] sm:$0xff] %v396_v42  ;;  %538 = vperm.xlu2 %3382, %v504_v19   ;;  %777 = vperm.xlu1 %3384, %v767_v22   ;;  %v3238_v28 = vld [vmem:[%s4393_s3 + $0x18] sm:$0xff] }
  0xaa   : > { %v392_v39 = vrot.slane %v384_v34, 4 }
  0xac   : > { %v401_v45 = vsel %vm393_vm0, %v391_v32, %v392_v39  ;;  %652 = vmatpush.bf16.msra.mxu0 %v2787_v40  ;;  %681 = vmatpush.bf16.msra.mxu1 %v2791_v41  ;;  %v376_v53 = vpop.permute.xlu1 %375 }
  0xad   : > { %v402_v49 = vsel %vm395_vm2, %v382_v58, %v401_v45  ;;  %v388_v56 = vrot.slane %v376_v53, 4  ;;  %v2762_v61 = vld [vmem:[#allocation3 + $0x10] sm:$0xf]  ;;  %v3241_v0 = vld [vmem:[#allocation3 + $0x14] sm:$0xf] }
  0xae   : > { %410 = vst [vmem:[#allocation3 + $0x18] sm:$0xff] %v402_v49 }
  0xb0   : > { %653 = vmatpush.bf16.msra.mxu0 %v2779_v46  ;;  %682 = vmatpush.bf16.msra.mxu1 %v2783_v47  ;;  %v2754_v10 = vld [vmem:[#allocation3] sm:$0xf]  ;;  %v3239_v14 = vld [vmem:[#allocation3 + $0x4] sm:$0xf] }
  0xb1   : > { %v374_v57 = vpop.permute.xlu0 %373  ;;  %533 = vperm.xlu2 %3382, %v503_v21  }
  0xb2   : > { %v387_v59 = vrot.slane %v374_v57, 4 }
  0xb4   : > { %654 = vmatpush.bf16.msra.mxu0 %v2771_v54  ;;  %683 = vmatpush.bf16.msra.mxu1 %v2775_v55  ;;  %v397_v58 = vsel %vm393_vm0, %v387_v59, %v388_v56  ;;  %v529_v40 = vpop.permute.xlu1 %528 }
  0xb5   : > { %v398_v62 = vsel %vm395_vm2, %v374_v57, %v397_v58  ;;  %v3242_v63 = vld [vmem:[#allocation3 + $0x14] sm:$0xf0]  ;;  %v2764_v3 = vld [vmem:[#allocation3 + $0x18] sm:$0xf0] }
  0xb6   : > { %408 = vst [vmem:[#allocation3 + $0x8] sm:$0xff] %v398_v62  ;;  %v2763_v6 = vor.u32 %v3242_v63, %v2762_v61  ;;  %v2767_v7 = vor.u32 %v3241_v0, %v2764_v3 }
  0xb8   : > { %655 = vmatpush.bf16.msra.mxu0 %v2763_v6  ;;  %684 = vmatpush.bf16.msra.mxu1 %v2767_v7 }
  0xb9   : > { %523 = vperm.xlu2 %3382, %v501_v24   ;;  %v544_v53 = vpop.permute.xlu0 %543 }
  0xbd   : > { %v3240_v11 = vld [vmem:[#allocation3 + $0x4] sm:$0xf0]  ;;  %v2756_v15 = vld [vmem:[#allocation3 + $0x8] sm:$0xf0] }
  0xbe   : > { %v2755_v16 = vor.u32 %v3240_v11, %v2754_v10  ;;  %v2759_v17 = vor.u32 %v3239_v14, %v2756_v15 }
  0xc0   : > { %656 = vmatpush.bf16.msra.mxu0 %v2755_v16  ;;  %685 = vmatpush.bf16.msra.mxu1 %v2759_v17 }
  0xc1   : > { %787 = vperm.xlu2 %3382, %v769_v26  }
  0xc3   : > { %2808 = vmatmul.msk.bf16.vlgmr.msra.gmra.mxu0 %vm636_vm3, %v3235_v18  ;;  %2812 = vmatmul.msk.bf16.vlgmr.msra.gmra.mxu1 %vm636_vm3, %v3235_v18 }
  0xc9   : > { %782 = vperm.xlu2 %3382, %v768_v27  }
  0xd3   : > { %2809 = vmatmul.msk.bf16.gmra.mxu0 %vm636_vm3, %v3236_v20  ;;  %2813 = vmatmul.msk.bf16.gmra.mxu1 %vm636_vm3, %v3236_v20 }
  0xe3   : > { %2810 = vmatmul.msk.bf16.gmra.mxu0 %vm636_vm3, %v3237_v25  ;;  %2814 = vmatmul.msk.bf16.gmra.mxu1 %vm636_vm3, %v3237_v25 }
  0xf3   : > { %2811 = vmatmul.msk.bf16.gmra.mxu0 %vm636_vm3, %v3238_v28  ;;  %2815 = vmatmul.msk.bf16.gmra.mxu1 %vm636_vm3, %v3238_v28 }
  0xfd   : > { %v509_v17 = vpop.permute.xlu0 %508 }
  0xfe   : > { %v519_v49 = vpop.permute.xlu1 %518 }
 0x103   : > { %v539_v39 = vpop.permute.xlu2 %538 }
 0x10b   : > { %v534_v43 = vpop.permute.xlu2 %533  ;;  %v514_v10 = vpop.permute.xlu1 %513 }
 0x113   : > { %v524_v0 = vpop.permute.xlu2 %523 }
 0x140   : > { %v658_v29 = vpop.f32.mrf.mxu0  ;;  %v3814_v30 = vpop.f32.mrf.mxu1 }
 0x141   : > { %v659_v25 = vadd.f32 %v658_v29, %v509_v17  ;;  %v688_v28 = vadd.f32 %v3814_v30, %v509_v17  ;;  %v323_v17 = vld [vmem:[%s308_s8] sm:$0x3]  ;;  %s3614_s8 = smov 120  }
 0x148   : > { %v660_v31 = vpop.f32.mrf.mxu0  ;;  %v689_v32 = vpop.f32.mrf.mxu1 }
 0x149   : > { %v661_v20 = vadd.f32 %v660_v31, %v514_v10  ;;  %v690_v22 = vadd.f32 %v689_v32, %v514_v10  ;;  %v1010_v10 = vld [vmem:[#allocation2 + $0x3c] sm:$0xf] }
 0x150   : > { %v663_v33 = vpop.f32.mrf.mxu0  ;;  %v692_v34 = vpop.f32.mrf.mxu1 }
 0x151   : > { %v664_v3 = vadd.f32 %v663_v33, %v519_v49  ;;  %v693_v11 = vadd.f32 %v692_v34, %v519_v49 }
 0x158   : > { %v665_v35 = vpop.f32.mrf.mxu0  ;;  %v694_v36 = vpop.f32.mrf.mxu1 }
 0x159   : > { %v666_v15 = vadd.f32 %v665_v35, %v524_v0  ;;  %v695_v18 = vadd.f32 %v694_v36, %v524_v0 }
 0x160   : > { %v668_v37 = vpop.f32.mrf.mxu0  ;;  %v697_v38 = vpop.f32.mrf.mxu1 }
 0x161   : > { %v669_v51 = vadd.f32 %v668_v37, %v529_v40  ;;  %v698_v54 = vadd.f32 %v697_v38, %v529_v40 }
 0x163   : > { %v715_v59 = vmul.f32 0.5, %v669_v51  ;;  %v716_v60 = vmul.f32 0.5, %v698_v54 }
 0x168   : > { %v670_v41 = vpop.f32.mrf.mxu0  ;;  %v699_v42 = vpop.f32.mrf.mxu1 }
 0x169   : > { %v671_v46 = vadd.f32 %v670_v41, %v534_v43  ;;  %v700_v50 = vadd.f32 %v699_v42, %v534_v43 }
 0x16b   : > { %v717_v56 = vmul.f32 0.5, %v671_v46  ;;  %v718_v57 = vmul.f32 0.5, %v700_v50 }
 0x170   : > { %v673_v44 = vpop.f32.mrf.mxu0  ;;  %v702_v45 = vpop.f32.mrf.mxu1 }
 0x171   : > { %v674_v47 = vadd.f32 %v673_v44, %v539_v39  ;;  %v703_v48 = vadd.f32 %v702_v45, %v539_v39 }
 0x173   : > { %v719_v52 = vmul.f32 0.5, %v674_v47  ;;  %v720_v55 = vmul.f32 0.5, %v703_v48 }
 0x175   : > { %3415 = vtanh.f32 %v719_v52 }
 0x176   : > { %3417 = vtanh.f32 %v720_v55 }
 0x177   : > { %3419 = vtanh.f32 %v717_v56 }
 0x178   : > { %v675_v58 = vpop.f32.mrf.mxu0  ;;  %v704_v61 = vpop.f32.mrf.mxu1  ;;  %3421 = vtanh.f32 %v718_v57 }
 0x179   : > { %v676_v62 = vadd.f32 %v675_v58, %v544_v53  ;;  %v705_v63 = vadd.f32 %v704_v61, %v544_v53  ;;  %3423 = vtanh.f32 %v715_v59 }
 0x17a   : > { %3425 = vtanh.f32 %v716_v60 }
 0x17b   : > { %v721_v6 = vmul.f32 0.5, %v676_v62  ;;  %v722_v7 = vmul.f32 0.5, %v705_v63  ;;  %v3416_v14 = vpop.eup %3415 }
 0x17c   : > { %v3418_v16 = vpop.eup %3417  ;;  %v735_v23 = vmul.f32 0.5, %v3416_v14  ;;  %v1004_v14 = vld [vmem:[#allocation2 + $0xc] sm:$0xf] }
 0x17d   : > { %3427 = vtanh.f32 %v721_v6  ;;  %v3420_v19 = vpop.eup %3419  ;;  %v736_v26 = vmul.f32 0.5, %v3418_v16  ;;  %v3254_v6 = vld [vmem:[%s4395_s5 + $0x8] sm:$0xff] }
 0x17e   : > { %3429 = vtanh.f32 %v722_v7  ;;  %v3422_v21 = vpop.eup %3421  ;;  %v733_v33 = vmul.f32 0.5, %v3420_v19  ;;  %v743_v37 = vadd.f32 0.5, %v735_v23  ;;  %v1008_v7 = vld [vmem:[#allocation2 + $0x2c] sm:$0xf]  ;;  %v778_v19 = vpop.permute.xlu1 %777 }
 0x17f   : > { %3431 = vtanh.f32 %v664_v3  ;;  %v3424_v24 = vpop.eup %3423  ;;  %v734_v35 = vmul.f32 0.5, %v3422_v21  ;;  %v744_v40 = vadd.f32 0.5, %v736_v26  ;;  %v3253_v3 = vld [vmem:[%s4395_s5] sm:$0xff]  ;;  %v3833_v21 = vperm.slane %v323_v17, 0 }
 0x180   : > { %3433 = vtanh.f32 %v693_v11  ;;  %v3426_v27 = vpop.eup %3425  ;;  %v731_v31 = vmul.f32 0.5, %v3424_v24  ;;  %v741_v42 = vadd.f32 0.5, %v733_v33  ;;  %v3385_v11 = vpack.i.bf16 %v1010_v10, %v1008_v7  ;;  %v2849_v7 = vld [vmem:[%s4394_s4 + $0x48] sm:$0xff] }
 0x181   : > { %3435 = vtanh.f32 %v666_v15  ;;  %v732_v39 = vmul.f32 0.5, %v3426_v27  ;;  %v742_v44 = vadd.f32 0.5, %v734_v35  ;;  %v1006_v15 = vld [vmem:[#allocation2 + $0x1c] sm:$0xf]  ;;  %v3835_v24 = vperm.slane %v323_v17, 1  ;;  %v2945_v10 = vld [vmem:[%s4396_s6 + $0x48] sm:$0xff] }
 0x182   : > { %3437 = vtanh.f32 %v695_v18  ;;  %v739_v47 = vadd.f32 0.5, %v731_v31  ;;  %3386 = vrot.lane.b32.xlu1 %v3385_v11, %s3610_s21  ;;  %v3390_v16 = vpack.i.bf16 %v1006_v15, %v1004_v14  ;;  %v788_v18 = vpop.permute.xlu2 %787  ;;  %v2848_v11 = vld [vmem:[%s4394_s4 + $0x40] sm:$0xff]  ;;  %v2947_v15 = vld [vmem:[%s4396_s6 + $0x58] sm:$0xff]  ;;  %v3255_v17 = vld [vmem:[%s4395_s5 + $0x10] sm:$0xff] }
 0x183   : > { %v3428_v34 = vpop.eup %3427  ;;  %3439 = vtanh.f32 %v661_v20  ;;  %v740_v51 = vadd.f32 0.5, %v732_v39  ;;  %v2944_v14 = vld [vmem:[%s4396_s6 + $0x40] sm:$0xff] }
 0x184   : > { %v3430_v36 = vpop.eup %3429  ;;  %3441 = vtanh.f32 %v690_v22  ;;  %v737_v38 = vmul.f32 0.5, %v3428_v34 }
 0x185   : > { %v3432_v32 = vpop.eup %3431  ;;  %3443 = vtanh.f32 %v659_v25  ;;  %v738_v29 = vmul.f32 0.5, %v3430_v36 }
 0x186   : > { %v3434_v41 = vpop.eup %3433  ;;  %3445 = vtanh.f32 %v688_v28  ;;  %v745_v43 = vadd.f32 0.5, %v737_v38  ;;  %v751_v48 = vmul.f32 %v3432_v32, %v743_v37 }
 0x187   : > { %v3436_v30 = vpop.eup %3435  ;;  %v746_v45 = vadd.f32 0.5, %v738_v29  ;;  %v752_v52 = vmul.f32 %v3434_v41, %v744_v40 }
 0x188   : > { %v3438_v46 = vpop.eup %3437  ;;  %v753_v49 = vmul.f32 %v3436_v30, %v745_v43 }
 0x189   : > { %v3440_v50 = vpop.eup %3439  ;;  %v754_v53 = vmul.f32 %v3438_v46, %v746_v45  ;;  %v793_v45 = vpop.permute.xlu0 %792 }
 0x18a   : > { %v3442_v54 = vpop.eup %3441  ;;  %v757_v55 = vpack.c.bf16 %v753_v49, %v751_v48  ;;  %v749_v56 = vmul.f32 %v3440_v50, %v741_v42  ;;  %3391 = vrot.lane.b32.xlu1 %v3390_v16, %s3610_s21  ;;  %v783_v34 = vpop.permute.xlu2 %782 }
 0x18b   : > { %v3444_v57 = vpop.eup %3443  ;;  %v758_v59 = vpack.c.bf16 %v754_v53, %v752_v52  ;;  %v750_v60 = vmul.f32 %v3442_v54, %v742_v44 }
 0x18c   : > { %v3446_v58 = vpop.eup %3445  ;;  %854 = vmatpush.bf16.msra.mxu2 %v757_v55  ;;  %v747_v61 = vmul.f32 %v3444_v57, %v739_v47 }
 0x18d   : > { %883 = vmatpush.bf16.msra.mxu3 %v758_v59  ;;  %v748_v62 = vmul.f32 %v3446_v58, %v740_v51  ;;  %v2855_v58 = vld [vmem:[%s4394_s4 + $0x78] sm:$0xff] }
 0x18e   : > { %v755_v63 = vpack.c.bf16 %v749_v56, %v747_v61 }
 0x18f   : > { %v756_v0 = vpack.c.bf16 %v750_v60, %v748_v62  ;;  %v2852_v60 = vld [vmem:[%s4394_s4 + $0x60] sm:$0xff]  ;;  %v2851_v62 = vld [vmem:[%s4394_s4 + $0x58] sm:$0xff] }
 0x190   : > { %855 = vmatpush.bf16.msra.mxu2 %v755_v63  ;;  %v2854_v63 = vld [vmem:[%s4394_s4 + $0x70] sm:$0xff] }
 0x191   : > { %884 = vmatpush.bf16.msra.mxu3 %v756_v0  ;;  %v2850_v0 = vld [vmem:[%s4394_s4 + $0x50] sm:$0xff] }
 0x193   : > { %2832 = vmatmul.msk.bf16.vlgmr.msra.gmra.mxu2 %vm835_vm4, %v3253_v3 }
 0x194   : > { %2836 = vmatmul.msk.bf16.vlgmr.msra.gmra.mxu3 %vm835_vm4, %v3253_v3  ;;  %v2946_v3 = vld [vmem:[%s4396_s6 + $0x50] sm:$0xff] }
 0x1a3   : > { %2833 = vmatmul.msk.bf16.gmra.mxu2 %vm835_vm4, %v3254_v6 }
 0x1a4   : > { %2837 = vmatmul.msk.bf16.gmra.mxu3 %vm835_vm4, %v3254_v6  ;;  %v2853_v6 = vld [vmem:[%s4394_s4 + $0x68] sm:$0xff] }
 0x1b3   : > { %2834 = vmatmul.msk.bf16.gmra.mxu2 %vm835_vm4, %v3255_v17 }
 0x1b4   : > { %2838 = vmatmul.msk.bf16.gmra.mxu3 %vm835_vm4, %v3255_v17 }
 0x1f4   : > { %v3387_v16 = vpop.permute.xlu1 %3386 }
 0x216   : > { %v857_v20 = vpop.f32.mrf.mxu2 }
 0x217   : > { %v858_v22 = vadd.f32 %v857_v20, %v778_v19  ;;  %v886_v23 = vpop.f32.mrf.mxu3  ;;  %v3274_v20 = vld [vmem:[#allocation3 + $0x64] sm:$0xf0] }
 0x218   : > { %v887_v25 = vadd.f32 %v886_v23, %v778_v19  ;;  %v2922_v19 = vld [vmem:[#allocation3 + $0x60] sm:$0xf]  ;;  %v3273_v23 = vld [vmem:[#allocation3 + $0x64] sm:$0xf] }
 0x219   : > { %v906_v26 = vadd.f32 %v858_v22, %v3726_v8  ;;  %v2923_v22 = vor.u32 %v3274_v20, %v2922_v19 }
 0x21a   : > { %v907_v27 = vadd.f32 %v887_v25, %v3728_v9  ;;  %v2924_v25 = vld [vmem:[#allocation3 + $0x68] sm:$0xf0] }
 0x21b   : > { %v3840_v28 = vmul.f32 %v906_v26, %v3833_v21  ;;  %v3389_v26 = vunpack.i.h.bf16 %v3387_v16  ;;  %1235 = vmatpush.bf16.msrb.mxu2 %v2923_v22 }
 0x21c   : > { %v3843_v33 = vmul.f32 %v907_v27, %v3835_v24 }
 0x21e   : > { %v922_v35 = vpack.c.bf16 %v3843_v33, %v3840_v28  ;;  %v859_v36 = vpop.f32.mrf.mxu2 }
 0x21f   : > { %v860_v31 = vadd.f32 %v859_v36, %v783_v34  ;;  %v888_v37 = vpop.f32.mrf.mxu3 }
 0x220   : > { %926 = vst [vmem:[#allocation2 + $0x4] sm:$0xff] %v922_v35  ;;  %v889_v38 = vadd.f32 %v888_v37, %v783_v34  ;;  %1019 = vrot.lane.b32.xlu0 %v922_v35, %s3610_s21  ;;  %v2927_v34 = vor.u32 %v3273_v23, %v2924_v25 }
 0x221   : > { %v908_v8 = vadd.f32 %v860_v31, %v3732_v12  ;;  %999 = vst [vmem:[#allocation3 + $0x20] sm:$0xff] %v922_v35  ;;  %v1042_v35 = vrot.slane %v3389_v26, 4 }
 0x222   : > { %v909_v9 = vadd.f32 %v889_v38, %v3734_v13  ;;  %1264 = vmatpush.bf16.msrb.mxu3 %v2927_v34 }
 0x223   : > { %v3851_v32 = vmul.f32 %v908_v8, %v3833_v21 }
 0x224   : > { %v3854_v39 = vmul.f32 %v909_v9, %v3835_v24  ;;  %v3256_v9 = vld [vmem:[%s4395_s5 + $0x18] sm:$0xff] }
 0x225   : > { %2835 = vmatmul.msk.bf16.gmra.mxu2 %vm835_vm4, %v3256_v9  ;;  %2839 = vmatmul.msk.bf16.gmra.mxu3 %vm835_vm4, %v3256_v9 }
 0x226   : > { %v923_v40 = vpack.c.bf16 %v3854_v39, %v3851_v32  ;;  %v862_v29 = vpop.f32.mrf.mxu2 }
 0x227   : > { %v863_v41 = vadd.f32 %v862_v29, %v788_v18  ;;  %v891_v42 = vpop.f32.mrf.mxu3  ;;  %v939_v61 = vld [vmem:[#allocation2 + $0x8] sm:$0xf] }
 0x228   : > { %927 = vst [vmem:[#allocation2 + $0x14] sm:$0xff] %v923_v40  ;;  %v892_v43 = vadd.f32 %v891_v42, %v788_v18  ;;  %v3392_v18 = vpop.permute.xlu1 %3391 }
 0x229   : > { %v910_v30 = vadd.f32 %v863_v41, %v3720_v4  ;;  %1000 = vst [vmem:[#allocation3 + $0x28] sm:$0xff] %v923_v40  ;;  %v3393_v27 = vunpack.i.l.bf16 %v3392_v18 }
 0x22a   : > { %v911_v12 = vadd.f32 %v892_v43, %v3722_v5 }
 0x22b   : > { %v3861_v13 = vmul.f32 %v910_v30, %v3833_v21  ;;  %v1036_v36 = vrot.slane %v3393_v27, 4 }
 0x22c   : > { %v3864_v44 = vmul.f32 %v911_v12, %v3835_v24 }
 0x22e   : > { %v924_v46 = vpack.c.bf16 %v3864_v44, %v3861_v13  ;;  %v864_v47 = vpop.f32.mrf.mxu2 }
 0x22f   : > { %v865_v48 = vadd.f32 %v864_v47, %v793_v45  ;;  %v893_v49 = vpop.f32.mrf.mxu3  ;;  %v941_v56 = vld [vmem:[#allocation2 + $0x18] sm:$0xf]  ;;  %v940_v59 = vld [vmem:[#allocation2 + $0x10] sm:$0xff] }
 0x230   : > { %928 = vst [vmem:[#allocation2 + $0x24] sm:$0xff] %v924_v46  ;;  %v894_v50 = vadd.f32 %v893_v49, %v793_v45  ;;  %1027 = vrot.lane.b32.xlu0 %v924_v46, %s3610_s21  ;;  %v2892_v9 = vld [vmem:[#allocation3 + $0x28] sm:$0xf0] }
 0x231   : > { %v912_v4 = vadd.f32 %v865_v48, %v3714_v1  ;;  %1001 = vst [vmem:[#allocation3 + $0x30] sm:$0xff] %v924_v46  ;;  %v938_v1 = vld [vmem:[#allocation2] sm:$0xff]  ;;  %v3388_v48 = vunpack.i.l.bf16 %v3387_v16 }
 0x232   : > { %v913_v5 = vadd.f32 %v894_v50, %v3716_v2 }
 0x233   : > { %v3872_v51 = vmul.f32 %v912_v4, %v3833_v21  ;;  %v1040_v50 = vrot.slane %v3388_v48, 4 }
 0x234   : > { %v3875_v52 = vmul.f32 %v913_v5, %v3835_v24 }
 0x236   : > { %v925_v53 = vpack.c.bf16 %v3875_v52, %v3872_v51 }
 0x237   : > { %v943_v54 = vld [vmem:[#allocation2 + $0x28] sm:$0xf]  ;;  %v942_v55 = vld [vmem:[#allocation2 + $0x20] sm:$0xff] }
 0x238   : > { %929 = vst [vmem:[#allocation2 + $0x34] sm:$0xff] %v925_v53  ;;  %964 = vrot.lane.b32.xlu1 %v943_v54, %s3611_s13  ;;  %1031 = vrot.lane.b32.xlu2 %v925_v53, %s3610_s21 }
 0x239   : > { %962 = vrot.lane.b32.xlu0 %v942_v55, %s3611_s13  ;;  %1002 = vst [vmem:[#allocation3 + $0x38] sm:$0xff] %v925_v53 }
 0x23f   : > { %v945_v2 = vld [vmem:[#allocation2 + $0x38] sm:$0xf]  ;;  %v944_v57 = vld [vmem:[#allocation2 + $0x30] sm:$0xff] }
 0x240   : > { %954 = vrot.lane.b32.xlu1 %v938_v1, %s3611_s13  ;;  %1023 = vrot.lane.b32.xlu2 %v923_v40, %s3610_s21  ;;  %v3394_v40 = vunpack.i.h.bf16 %v3392_v18  ;;  %v3268_v23 = vld [vmem:[#allocation3 + $0x34] sm:$0xf0]  ;;  %v2900_v25 = vld [vmem:[#allocation3 + $0x38] sm:$0xf0]  ;;  %s3612_s21 = smov 124  }
 0x241   : > { %968 = vrot.lane.b32.xlu0 %v945_v2, %s3611_s13 }
 0x242   : > { %v1038_v30 = vrot.slane %v3394_v40, 4 }
 0x248   : > { %960 = vrot.lane.b32.xlu1 %v941_v56, %s3611_s13  ;;  %966 = vrot.lane.b32.xlu2 %v944_v57, %s3611_s13 }
 0x249   : > { %958 = vrot.lane.b32.xlu0 %v940_v59, %s3611_s13 }
 0x250   : > { %1114 = vperm.xlu1 %3384, %v2852_v60   ;;  %956 = vrot.lane.b32.xlu2 %v939_v61, %s3611_s13  ;;  %s3613_s13 = smov 4  }
 0x251   : > { %1129 = vperm.xlu0 %3383, %v2855_v58  }
 0x258   : > { %1109 = vperm.xlu1 %3384, %v2851_v62   ;;  %1124 = vperm.xlu2 %3382, %v2854_v63  }
 0x259   : > { %1104 = vperm.xlu0 %3383, %v2850_v0  }
 0x260   : > { %1374 = vperm.xlu1 %3384, %v2946_v3   ;;  %1119 = vperm.xlu2 %3382, %v2853_v6  }
 0x261   : > { %1099 = vperm.xlu0 %3383, %v2849_v7  }
 0x268   : > { %1369 = vperm.xlu1 %3384, %v2945_v10   ;;  %1094 = vperm.xlu2 %3382, %v2848_v11  }
 0x269   : > { %1364 = vperm.xlu0 %3383, %v2944_v14  }
 0x270   : > { %1379 = vperm.xlu2 %3382, %v2947_v15  }
 0x292   : > { %v1032_v31 = vpop.permute.xlu2 %1031  ;;  %v1020_v37 = vpop.permute.xlu0 %1019 }
 0x293   : > { %v1041_v38 = vrot.slane %v1032_v31, 4  ;;  %v1035_v8 = vrot.slane %v1020_v37, 4 }
 0x295   : > { %v1050_v29 = vsel %vm393_vm0, %v1041_v38, %v1042_v35  ;;  %v1043_v41 = vsel %vm393_vm0, %v1035_v8, %v1036_v36  ;;  %v2898_v35 = vld [vmem:[#allocation3 + $0x30] sm:$0xf]  ;;  %v3267_v36 = vld [vmem:[#allocation3 + $0x34] sm:$0xf]  ;;  %v3266_v8 = vld [vmem:[#allocation3 + $0x24] sm:$0xf0] }
 0x296   : > { %v1051_v42 = vsel %vm1044_vm5, %v1032_v31, %v1050_v29  ;;  %v1045_v43 = vsel %vm1044_vm5, %v1020_v37, %v1043_v41  ;;  %v2899_v37 = vor.u32 %v3268_v23, %v2898_v35  ;;  %v2903_v38 = vor.u32 %v3267_v36, %v2900_v25  ;;  %v2890_v29 = vld [vmem:[#allocation3 + $0x20] sm:$0xf]  ;;  %v3265_v41 = vld [vmem:[#allocation3 + $0x24] sm:$0xf] }
 0x297   : > { %1059 = vst [vmem:[#allocation3 + $0x58] sm:$0xff] %v1051_v42 }
 0x298   : > { %1056 = vst [vmem:[#allocation3 + $0x40] sm:$0xff] %v1045_v43 }
 0x29a   : > { %v1024_v12 = vpop.permute.xlu2 %1023 }
 0x29b   : > { %v1037_v45 = vrot.slane %v1024_v12, 4 }
 0x29d   : > { %v1046_v46 = vsel %vm393_vm0, %v1037_v45, %v1038_v30  ;;  %v2891_v30 = vor.u32 %v3266_v8, %v2890_v29 }
 0x29e   : > { %v1047_v47 = vsel %vm1044_vm5, %v1024_v12, %v1046_v46  ;;  %v3272_v57 = vld [vmem:[#allocation3 + $0x54] sm:$0xf0]  ;;  %v2916_v61 = vld [vmem:[#allocation3 + $0x58] sm:$0xf0]  ;;  %v2895_v12 = vor.u32 %v3265_v41, %v2892_v9 }
 0x29f   : > { %1057 = vst [vmem:[#allocation3 + $0x48] sm:$0xff] %v1047_v47  ;;  %v2906_v11 = vld [vmem:[#allocation3 + $0x40] sm:$0xf]  ;;  %v3269_v14 = vld [vmem:[#allocation3 + $0x44] sm:$0xf] }
 0x2a2   : > { %v1028_v49 = vpop.permute.xlu0 %1027  ;;  %v967_v53 = vpop.permute.xlu2 %966 }
 0x2a3   : > { %v1039_v4 = vrot.slane %v1028_v49, 4  ;;  %v976_v20 = vrot.slane %v967_v53, 4 }
 0x2a5   : > { %v1048_v5 = vsel %vm393_vm0, %v1039_v4, %v1040_v50 }
 0x2a6   : > { %v1049_v54 = vsel %vm1044_vm5, %v1028_v49, %v1048_v5  ;;  %v3270_v6 = vld [vmem:[#allocation3 + $0x44] sm:$0xf0]  ;;  %v2908_v7 = vld [vmem:[#allocation3 + $0x48] sm:$0xf0] }
 0x2a7   : > { %1058 = vst [vmem:[#allocation3 + $0x50] sm:$0xff] %v1049_v54  ;;  %v2907_v18 = vor.u32 %v3270_v6, %v2906_v11  ;;  %v2911_v19 = vor.u32 %v3269_v14, %v2908_v7 }
 0x2aa   : > { %v965_v55 = vpop.permute.xlu1 %964  ;;  %v957_v3 = vpop.permute.xlu2 %956 }
 0x2ab   : > { %v975_v1 = vrot.slane %v965_v55, 4  ;;  %v963_v2 = vpop.permute.xlu0 %962  ;;  %v971_v15 = vrot.slane %v957_v3, 4 }
 0x2ac   : > { %v974_v56 = vrot.slane %v963_v2, 4 }
 0x2ae   : > { %v983_v59 = vsel %vm393_vm0, %v974_v56, %v975_v1  ;;  %v2914_v60 = vld [vmem:[#allocation3 + $0x50] sm:$0xf]  ;;  %v3271_v58 = vld [vmem:[#allocation3 + $0x54] sm:$0xf] }
 0x2af   : > { %v984_v62 = vsel %vm979_vm6, %v963_v2, %v983_v59  ;;  %v2915_v63 = vor.u32 %v3272_v57, %v2914_v60  ;;  %v2919_v0 = vor.u32 %v3271_v58, %v2916_v61  ;;  %v3257_v59 = vld [vmem:[%s4393_s3 + $0x20] sm:$0xff]  ;;  %v3258_v60 = vld [vmem:[%s4393_s3 + $0x28] sm:$0xff]  ;;  %v3259_v58 = vld [vmem:[%s4393_s3 + $0x30] sm:$0xff] }
 0x2b0   : > { %993 = vst [vmem:[#allocation3 + $0x10] sm:$0xff] %v984_v62  ;;  %v3260_v61 = vld [vmem:[%s4393_s3 + $0x38] sm:$0xff]  ;;  %v3963_v62 = vpop.f32.mrf.mxu2 }
 0x2b1   : > { %1236 = vmatpush.bf16.msrb.mxu2 %v2915_v63  ;;  %1265 = vmatpush.bf16.msrb.mxu3 %v2919_v0  ;;  %v3965_v63 = vpop.f32.mrf.mxu3 }
 0x2b2   : > { %v955_v10 = vpop.permute.xlu1 %954 }
 0x2b3   : > { %v970_v16 = vrot.slane %v955_v10, 4  ;;  %v969_v17 = vpop.permute.xlu0 %968 }
 0x2b4   : > { %v977_v22 = vrot.slane %v969_v17, 4 }
 0x2b5   : > { %v978_v26 = vsel %vm393_vm0, %v970_v16, %v971_v15  ;;  %1237 = vmatpush.bf16.msrb.mxu2 %v2907_v18  ;;  %1266 = vmatpush.bf16.msrb.mxu3 %v2911_v19 }
 0x2b6   : > { %v980_v27 = vsel %vm979_vm6, %v955_v10, %v978_v26  ;;  %v985_v34 = vsel %vm393_vm0, %v976_v20, %v977_v22  ;;  %v1125_v26 = vpop.permute.xlu2 %1124 }
 0x2b7   : > { %991 = vst [vmem:[#allocation3] sm:$0xff] %v980_v27  ;;  %v986_v31 = vsel %vm979_vm6, %v967_v53, %v985_v34  ;;  %v2882_v47 = vld [vmem:[#allocation3 + $0x10] sm:$0xf]  ;;  %v3263_v50 = vld [vmem:[#allocation3 + $0x14] sm:$0xf] }
 0x2b8   : > { %994 = vst [vmem:[#allocation3 + $0x18] sm:$0xff] %v986_v31  ;;  %v3967_v0 = vpop.f32.mrf.mxu2 }
 0x2b9   : > { %1238 = vmatpush.bf16.msrb.mxu2 %v2899_v37  ;;  %1267 = vmatpush.bf16.msrb.mxu3 %v2903_v38  ;;  %v3969_v3 = vpop.f32.mrf.mxu3 }
 0x2ba   : > { %v961_v40 = vpop.permute.xlu1 %960 }
 0x2bb   : > { %v973_v42 = vrot.slane %v961_v40, 4  ;;  %v959_v43 = vpop.permute.xlu0 %958 }
 0x2bc   : > { %v972_v45 = vrot.slane %v959_v43, 4 }
 0x2bd   : > { %1239 = vmatpush.bf16.msrb.mxu2 %v2891_v30  ;;  %1268 = vmatpush.bf16.msrb.mxu3 %v2895_v12 }
 0x2be   : > { %v981_v46 = vsel %vm393_vm0, %v972_v45, %v973_v42  ;;  %v2874_v54 = vld [vmem:[#allocation3] sm:$0xf]  ;;  %v3261_v1 = vld [vmem:[#allocation3 + $0x4] sm:$0xf]  ;;  %v1120_v36 = vpop.permute.xlu2 %1119 }
 0x2bf   : > { %v982_v48 = vsel %vm979_vm6, %v959_v43, %v981_v46  ;;  %v3264_v49 = vld [vmem:[#allocation3 + $0x14] sm:$0xf0]  ;;  %v2884_v4 = vld [vmem:[#allocation3 + $0x18] sm:$0xf0] }
 0x2c0   : > { %992 = vst [vmem:[#allocation3 + $0x8] sm:$0xff] %v982_v48  ;;  %v2883_v5 = vor.u32 %v3264_v49, %v2882_v47  ;;  %v2887_v53 = vor.u32 %v3263_v50, %v2884_v4  ;;  %v3971_v6 = vpop.f32.mrf.mxu2 }
 0x2c1   : > { %v3973_v7 = vpop.f32.mrf.mxu3 }
 0x2c2   : > { %1240 = vmatpush.bf16.msrb.mxu2 %v2883_v5  ;;  %1269 = vmatpush.bf16.msrb.mxu3 %v2887_v53  ;;  %v1115_v31 = vpop.permute.xlu1 %1114 }
 0x2c3   : > { %v1130_v35 = vpop.permute.xlu0 %1129 }
 0x2c6   : > { %v1095_v47 = vpop.permute.xlu2 %1094 }
 0x2c7   : > { %v3262_v55 = vld [vmem:[#allocation3 + $0x4] sm:$0xf0]  ;;  %v2876_v2 = vld [vmem:[#allocation3 + $0x8] sm:$0xf0] }
 0x2c8   : > { %v2875_v56 = vor.u32 %v3262_v55, %v2874_v54  ;;  %v2879_v57 = vor.u32 %v3261_v1, %v2876_v2  ;;  %v3975_v10 = vpop.f32.mrf.mxu2 }
 0x2c9   : > { %v3977_v11 = vpop.f32.mrf.mxu3 }
 0x2ca   : > { %1241 = vmatpush.bf16.msrb.mxu2 %v2875_v56  ;;  %1270 = vmatpush.bf16.msrb.mxu3 %v2879_v57  ;;  %v1110_v57 = vpop.permute.xlu1 %1109 }
 0x2cb   : > { %v1105_v30 = vpop.permute.xlu0 %1104 }
 0x2cd   : > { %2928 = vmatmul.msk.bf16.vlgmr.msrb.gmra.mxu2 %vm636_vm3, %v3257_v59  ;;  %2932 = vmatmul.msk.bf16.vlgmr.msrb.gmra.mxu3 %vm636_vm3, %v3257_v59 }
 0x2dd   : > { %2929 = vmatmul.msk.bf16.gmra.mxu2 %vm636_vm3, %v3258_v60  ;;  %2933 = vmatmul.msk.bf16.gmra.mxu3 %vm636_vm3, %v3258_v60 }
 0x2ed   : > { %2930 = vmatmul.msk.bf16.gmra.mxu2 %vm636_vm3, %v3259_v58  ;;  %2934 = vmatmul.msk.bf16.gmra.mxu3 %vm636_vm3, %v3259_v58 }
 0x2fd   : > { %2931 = vmatmul.msk.bf16.gmra.mxu2 %vm636_vm3, %v3260_v61  ;;  %2935 = vmatmul.msk.bf16.gmra.mxu3 %vm636_vm3, %v3260_v61 }
 0x350   : > { %v1243_v14 = vpop.f32.mrf.mxu2  ;;  %v3979_v15 = vpop.f32.mrf.mxu3 }
 0x351   : > { %v1244_v49 = vadd.f32 %v1243_v14, %v1095_v47  ;;  %v1100_v14 = vpop.permute.xlu0 %1099 }
 0x358   : > { %v1245_v16 = vpop.f32.mrf.mxu2  ;;  %v1274_v17 = vpop.f32.mrf.mxu3 }
 0x360   : > { %v1248_v18 = vpop.f32.mrf.mxu2  ;;  %v1277_v19 = vpop.f32.mrf.mxu3 }
 0x361   : > { %v1249_v55 = vadd.f32 %v1248_v18, %v1105_v30  ;;  %v1278_v59 = vadd.f32 %v1277_v19, %v1105_v30  ;;  %v1273_v19 = vadd.f32 %v3979_v15, %v1095_v47 }
 0x368   : > { %v1250_v20 = vpop.f32.mrf.mxu2  ;;  %v1279_v22 = vpop.f32.mrf.mxu3 }
 0x369   : > { %v1251_v58 = vadd.f32 %v1250_v20, %v1110_v57 }
 0x370   : > { %v1253_v23 = vpop.f32.mrf.mxu2  ;;  %v1282_v25 = vpop.f32.mrf.mxu3 }
 0x371   : > { %v1254_v37 = vadd.f32 %v1253_v23, %v1115_v31  ;;  %v1283_v12 = vadd.f32 %v1282_v25, %v1115_v31  ;;  %v1280_v23 = vadd.f32 %v1279_v22, %v1110_v57 }
 0x373   : > { %v1300_v41 = vmul.f32 0.5, %v1254_v37  ;;  %v1301_v50 = vmul.f32 0.5, %v1283_v12 }
 0x375   : > { %3447 = vtanh.f32 %v1300_v41 }
 0x378   : > { %v1255_v27 = vpop.f32.mrf.mxu2  ;;  %v1284_v34 = vpop.f32.mrf.mxu3 }
 0x379   : > { %v1256_v9 = vadd.f32 %v1255_v27, %v1120_v36  ;;  %v1285_v42 = vadd.f32 %v1284_v34, %v1120_v36  ;;  %v1275_v34 = vadd.f32 %v1274_v17, %v1100_v14  ;;  %v1596_v17 = vld [vmem:[#allocation2 + $0x3c] sm:$0xf] }
 0x37b   : > { %v1302_v46 = vmul.f32 0.5, %v1256_v9  ;;  %v1303_v48 = vmul.f32 0.5, %v1285_v42  ;;  %v3448_v56 = vpop.eup %3447 }
 0x380   : > { %v1258_v38 = vpop.f32.mrf.mxu2  ;;  %v1287_v8 = vpop.f32.mrf.mxu3 }
 0x381   : > { %v1259_v40 = vadd.f32 %v1258_v38, %v1125_v26  ;;  %v1288_v29 = vadd.f32 %v1287_v8, %v1125_v26  ;;  %v1246_v26 = vadd.f32 %v1245_v16, %v1100_v14  ;;  %v1316_v38 = vmul.f32 0.5, %v3448_v56 }
 0x383   : > { %v1304_v43 = vmul.f32 0.5, %v1259_v40  ;;  %v1305_v45 = vmul.f32 0.5, %v1288_v29  ;;  %v1594_v40 = vld [vmem:[#allocation2 + $0x2c] sm:$0xf] }
 0x384   : > { %v3395_v30 = vpack.i.bf16 %v1596_v17, %v1594_v40 }
 0x385   : > { %3449 = vtanh.f32 %v1304_v43 }
 0x386   : > { %3451 = vtanh.f32 %v1305_v45  ;;  %3396 = vrot.lane.b32.xlu0 %v3395_v30, %s3612_s21 }
 0x387   : > { %3453 = vtanh.f32 %v1302_v46 }
 0x388   : > { %v1260_v4 = vpop.f32.mrf.mxu2  ;;  %v1289_v5 = vpop.f32.mrf.mxu3  ;;  %3455 = vtanh.f32 %v1303_v48 }
 0x389   : > { %v1261_v53 = vadd.f32 %v1260_v4, %v1130_v35  ;;  %v1290_v54 = vadd.f32 %v1289_v5, %v1130_v35  ;;  %3457 = vtanh.f32 %v1244_v49 }
 0x38a   : > { %3459 = vtanh.f32 %v1301_v50  ;;  %v1324_v50 = vadd.f32 0.5, %v1316_v38 }
 0x38b   : > { %v1306_v1 = vmul.f32 0.5, %v1261_v53  ;;  %v1307_v2 = vmul.f32 0.5, %v1290_v54  ;;  %v3450_v60 = vpop.eup %3449  ;;  %v1590_v53 = vld [vmem:[#allocation2 + $0xc] sm:$0xf]  ;;  %v1592_v54 = vld [vmem:[#allocation2 + $0x1c] sm:$0xf] }
 0x38c   : > { %v3452_v61 = vpop.eup %3451  ;;  %v1320_v18 = vmul.f32 0.5, %v3450_v60  ;;  %v3400_v14 = vpack.i.bf16 %v1592_v54, %v1590_v53 }
 0x38d   : > { %3461 = vtanh.f32 %v1306_v1  ;;  %v3454_v25 = vpop.eup %3453  ;;  %v1321_v36 = vmul.f32 0.5, %v3452_v61 }
 0x38e   : > { %3463 = vtanh.f32 %v1307_v2  ;;  %v3456_v27 = vpop.eup %3455  ;;  %v1318_v20 = vmul.f32 0.5, %v3454_v25  ;;  %v1328_v16 = vadd.f32 0.5, %v1320_v18  ;;  %v3275_v18 = vld [vmem:[%s4395_s5 + $0x20] sm:$0xff]  ;;  %3401 = vrot.lane.b32.xlu0 %v3400_v14, %s3612_s21 }
 0x38f   : > { %3465 = vtanh.f32 %v1249_v55  ;;  %v3458_v35 = vpop.eup %3457  ;;  %v1319_v22 = vmul.f32 0.5, %v3456_v27  ;;  %v1329_v42 = vadd.f32 0.5, %v1321_v36  ;;  %v1375_v36 = vpop.permute.xlu1 %1374 }
 0x390   : > { %3467 = vtanh.f32 %v1278_v59  ;;  %v3460_v31 = vpop.eup %3459  ;;  %v1326_v15 = vadd.f32 0.5, %v1318_v20  ;;  %v1332_v25 = vmul.f32 %v3458_v35, %v1324_v50  ;;  %v3276_v35 = vld [vmem:[%s4395_s5 + $0x28] sm:$0xff] }
 0x391   : > { %3469 = vtanh.f32 %v1251_v58  ;;  %v1317_v41 = vmul.f32 0.5, %v3460_v31  ;;  %v1327_v47 = vadd.f32 0.5, %v1319_v22  ;;  %v1365_v31 = vpop.permute.xlu0 %1364 }
 0x392   : > { %3471 = vtanh.f32 %v1280_v23 }
 0x393   : > { %v3462_v37 = vpop.eup %3461  ;;  %3473 = vtanh.f32 %v1246_v26  ;;  %v1325_v1 = vadd.f32 0.5, %v1317_v41 }
 0x394   : > { %v3464_v8 = vpop.eup %3463  ;;  %3475 = vtanh.f32 %v1275_v34  ;;  %v1322_v9 = vmul.f32 0.5, %v3462_v37 }
 0x395   : > { %v3466_v29 = vpop.eup %3465  ;;  %v1323_v43 = vmul.f32 0.5, %v3464_v8  ;;  %3477 = vtanh.f32 %v1273_v19 }
 0x396   : > { %v3468_v12 = vpop.eup %3467  ;;  %v1330_v45 = vadd.f32 0.5, %v1322_v9  ;;  %v1336_v4 = vmul.f32 %v3466_v29, %v1328_v16 }
 0x397   : > { %v3470_v46 = vpop.eup %3469  ;;  %v1331_v48 = vadd.f32 0.5, %v1323_v43  ;;  %v1337_v2 = vmul.f32 %v3468_v12, %v1329_v42  ;;  %v1370_v40 = vpop.permute.xlu1 %1369 }
 0x398   : > { %v3472_v49 = vpop.eup %3471  ;;  %v1338_v5 = vmul.f32 %v3470_v46, %v1330_v45 }
 0x399   : > { %v3474_v55 = vpop.eup %3473  ;;  %v1339_v56 = vmul.f32 %v3472_v49, %v1331_v48 }
 0x39a   : > { %v3476_v57 = vpop.eup %3475  ;;  %v1342_v59 = vpack.c.bf16 %v1338_v5, %v1336_v4  ;;  %v1334_v60 = vmul.f32 %v3474_v55, %v1326_v15  ;;  %v1380_v4 = vpop.permute.xlu2 %1379 }
 0x39b   : > { %v1343_v58 = vpack.c.bf16 %v1339_v56, %v1337_v2  ;;  %v1335_v61 = vmul.f32 %v3476_v57, %v1327_v47  ;;  %v3478_v23 = vpop.eup %3477 }
 0x39c   : > { %1440 = vmatpush.bf16.msrb.mxu0 %v1342_v59  ;;  %v1333_v26 = vmul.f32 %v3478_v23, %v1325_v1  ;;  %v1340_v27 = vpack.c.bf16 %v1334_v60, %v1332_v25  ;;  %v2988_v23 = vld [vmem:[%s4394_s4 + $0xa0] sm:$0xff]  ;;  %v2991_v25 = vld [vmem:[%s4394_s4 + $0xb8] sm:$0xff] }
 0x39d   : > { %1469 = vmatpush.bf16.msrb.mxu1 %v1343_v58 }
 0x39e   : > { %v1341_v34 = vpack.c.bf16 %v1335_v61, %v1333_v26 }
 0x3a0   : > { %1441 = vmatpush.bf16.msrb.mxu0 %v1340_v27  ;;  %v2987_v27 = vld [vmem:[%s4394_s4 + $0x98] sm:$0xff] }
 0x3a1   : > { %1470 = vmatpush.bf16.msrb.mxu1 %v1341_v34  ;;  %v2990_v34 = vld [vmem:[%s4394_s4 + $0xb0] sm:$0xff] }
 0x3a3   : > { %2968 = vmatmul.msk.bf16.vlgmr.msrb.gmra.mxu0 %vm835_vm4, %v3275_v18 }
 0x3a4   : > { %2972 = vmatmul.msk.bf16.vlgmr.msrb.gmra.mxu1 %vm835_vm4, %v3275_v18  ;;  %v2986_v18 = vld [vmem:[%s4394_s4 + $0x90] sm:$0xff] }
 0x3b3   : > { %2969 = vmatmul.msk.bf16.gmra.mxu0 %vm835_vm4, %v3276_v35 }
 0x3b4   : > { %2973 = vmatmul.msk.bf16.gmra.mxu1 %vm835_vm4, %v3276_v35  ;;  %v3082_v35 = vld [vmem:[%s4396_s6 + $0x90] sm:$0xff] }
 0x420   : > { %v1443_v19 = vpop.f32.mrf.mxu0 }
 0x421   : > { %v1444_v20 = vadd.f32 %v1443_v19, %v1365_v31  ;;  %v1472_v37 = vpop.f32.mrf.mxu1  ;;  %v3081_v19 = vld [vmem:[%s4396_s6 + $0x88] sm:$0xff] }
 0x422   : > { %v1473_v38 = vadd.f32 %v1472_v37, %v1365_v31  ;;  %v2985_v31 = vld [vmem:[%s4394_s4 + $0x88] sm:$0xff]  ;;  %v3080_v37 = vld [vmem:[%s4396_s6 + $0x80] sm:$0xff] }
 0x423   : > { %v1492_v22 = vadd.f32 %v1444_v20, %v3840_v28  ;;  %v2984_v20 = vld [vmem:[%s4394_s4 + $0x80] sm:$0xff] }
 0x424   : > { %v1493_v8 = vadd.f32 %v1473_v38, %v3843_v33  ;;  %v3397_v38 = vpop.permute.xlu0 %3396 }
 0x425   : > { %v3997_v16 = vmul.f32 %v1492_v22, %v3833_v21  ;;  %v3083_v22 = vld [vmem:[%s4396_s6 + $0x98] sm:$0xff] }
 0x426   : > { %v4000_v9 = vmul.f32 %v1493_v8, %v3835_v24 }
 0x428   : > { %v1508_v17 = vpack.c.bf16 %v4000_v9, %v3997_v16  ;;  %v1445_v29 = vpop.f32.mrf.mxu0 }
 0x429   : > { %v1446_v41 = vadd.f32 %v1445_v29, %v1370_v40  ;;  %v1474_v42 = vpop.f32.mrf.mxu1 }
 0x42a   : > { %1512 = vst [vmem:[#allocation2 + $0x4] sm:$0xff] %v1508_v17  ;;  %v1475_v43 = vadd.f32 %v1474_v42, %v1370_v40  ;;  %1605 = vrot.lane.b32.xlu2 %v1508_v17, %s3612_s21 }
 0x42b   : > { %v1494_v28 = vadd.f32 %v1446_v41, %v3851_v32  ;;  %1585 = vst [vmem:[#allocation3 + $0x20] sm:$0xff] %v1508_v17 }
 0x42c   : > { %v1495_v33 = vadd.f32 %v1475_v43, %v3854_v39  ;;  %v3402_v8 = vpop.permute.xlu0 %3401 }
 0x42d   : > { %v4008_v30 = vmul.f32 %v1494_v28, %v3833_v21  ;;  %v3403_v40 = vunpack.i.l.bf16 %v3402_v8  ;;  %v3398_v28 = vunpack.i.l.bf16 %v3397_v38 }
 0x42e   : > { %v4011_v12 = vmul.f32 %v1495_v33, %v3835_v24 }
 0x42f   : > { %v1622_v17 = vrot.slane %v3403_v40, 4  ;;  %v1626_v33 = vrot.slane %v3398_v28, 4 }
 0x430   : > { %v1509_v15 = vpack.c.bf16 %v4011_v12, %v4008_v30  ;;  %v1448_v45 = vpop.f32.mrf.mxu0 }
 0x431   : > { %v1449_v46 = vadd.f32 %v1448_v45, %v1375_v36  ;;  %v1477_v47 = vpop.f32.mrf.mxu1  ;;  %v1525_v26 = vld [vmem:[#allocation2 + $0x8] sm:$0xf] }
 0x432   : > { %1513 = vst [vmem:[#allocation2 + $0x14] sm:$0xff] %v1509_v15  ;;  %v1478_v48 = vadd.f32 %v1477_v47, %v1375_v36  ;;  %v2989_v36 = vld [vmem:[%s4394_s4 + $0xa8] sm:$0xff] }
 0x433   : > { %v1496_v49 = vadd.f32 %v1449_v46, %v3861_v13  ;;  %1586 = vst [vmem:[#allocation3 + $0x28] sm:$0xff] %v1509_v15 }
 0x434   : > { %v1497_v32 = vadd.f32 %v1478_v48, %v3864_v44  ;;  %v3058_v48 = vld [vmem:[#allocation3 + $0x60] sm:$0xf] }
 0x435   : > { %v4018_v39 = vmul.f32 %v1496_v49, %v3833_v21  ;;  %v3296_v49 = vld [vmem:[#allocation3 + $0x64] sm:$0xf0] }
 0x436   : > { %v4021_v50 = vmul.f32 %v1497_v32, %v3835_v24  ;;  %v3295_v32 = vld [vmem:[#allocation3 + $0x64] sm:$0xf] }
 0x438   : > { %v1510_v5 = vpack.c.bf16 %v4021_v50, %v4018_v39  ;;  %v1450_v53 = vpop.f32.mrf.mxu0 }
 0x439   : > { %v1451_v54 = vadd.f32 %v1450_v53, %v1380_v4  ;;  %v1479_v55 = vpop.f32.mrf.mxu1  ;;  %v1527_v58 = vld [vmem:[#allocation2 + $0x18] sm:$0xf]  ;;  %v1526_v14 = vld [vmem:[#allocation2 + $0x10] sm:$0xff] }
 0x43a   : > { %1514 = vst [vmem:[#allocation2 + $0x24] sm:$0xff] %v1510_v5  ;;  %v1480_v1 = vadd.f32 %v1479_v55, %v1380_v4  ;;  %1613 = vrot.lane.b32.xlu2 %v1510_v5, %s3612_s21  ;;  %v3059_v4 = vor.u32 %v3296_v49, %v3058_v48  ;;  %v3399_v55 = vunpack.i.h.bf16 %v3397_v38 }
 0x43b   : > { %v1498_v13 = vadd.f32 %v1451_v54, %v3872_v51  ;;  %1587 = vst [vmem:[#allocation3 + $0x30] sm:$0xff] %v1510_v5  ;;  %v1524_v51 = vld [vmem:[#allocation2] sm:$0xff]  ;;  %v3060_v5 = vld [vmem:[#allocation3 + $0x68] sm:$0xf0] }
 0x43c   : > { %v1499_v44 = vadd.f32 %v1480_v1, %v3875_v52  ;;  %v3063_v53 = vor.u32 %v3295_v32, %v3060_v5  ;;  %1821 = vmatpush.bf16.msra.mxu2 %v3059_v4  ;;  %v1628_v1 = vrot.slane %v3399_v55, 4 }
 0x43d   : > { %v4029_v2 = vmul.f32 %v1498_v13, %v3833_v21 }
 0x43e   : > { %v4032_v56 = vmul.f32 %v1499_v44, %v3835_v24  ;;  %1850 = vmatpush.bf16.msra.mxu3 %v3063_v53 }
 0x440   : > { %v1511_v57 = vpack.c.bf16 %v4032_v56, %v4029_v2 }
 0x441   : > { %v1529_v59 = vld [vmem:[#allocation2 + $0x28] sm:$0xf]  ;;  %v1528_v60 = vld [vmem:[#allocation2 + $0x20] sm:$0xff] }
 0x442   : > { %1515 = vst [vmem:[#allocation2 + $0x34] sm:$0xff] %v1511_v57  ;;  %1550 = vrot.lane.b32.xlu0 %v1529_v59, %s3613_s13  ;;  %1617 = vrot.lane.b32.xlu1 %v1511_v57, %s3612_s21  ;;  %v3289_v55 = vld [vmem:[#allocation3 + $0x34] sm:$0xf] }
 0x443   : > { %1548 = vrot.lane.b32.xlu2 %v1528_v60, %s3613_s13  ;;  %1588 = vst [vmem:[#allocation3 + $0x38] sm:$0xff] %v1511_v57 }
 0x449   : > { %v1531_v52 = vld [vmem:[#allocation2 + $0x38] sm:$0xf]  ;;  %v1530_v61 = vld [vmem:[#allocation2 + $0x30] sm:$0xff] }
 0x44a   : > { %1540 = vrot.lane.b32.xlu0 %v1524_v51, %s3613_s13  ;;  %1609 = vrot.lane.b32.xlu1 %v1509_v15, %s3612_s21  ;;  %v3290_v4 = vld [vmem:[#allocation3 + $0x34] sm:$0xf0]  ;;  %v3036_v5 = vld [vmem:[#allocation3 + $0x38] sm:$0xf0]  ;;  %s297_s21 = sand.u32 1, %s3597_s25  }
 0x44b   : > { %1554 = vrot.lane.b32.xlu2 %v1531_v52, %s3613_s13  ;;  %s2730_s22 = sshll.u32 %s297_s21, 6 }
 0x44c   : > { %s4326_s23 = scalar_lea.vmem [#allocation4], %s2730_s22 }
 0x44d   : > { %s2637_s28 = sshll.u32 %s4326_s23, 4  ;;  %s2638_s28 = int_to_ptr.vmem [resolvable:$true] %s2637_s28 }
 0x452   : > { %1546 = vrot.lane.b32.xlu0 %v1527_v58, %s3613_s13  ;;  %1552 = vrot.lane.b32.xlu1 %v1530_v61, %s3613_s13 }
 0x453   : > { %1544 = vrot.lane.b32.xlu2 %v1526_v14, %s3613_s13 }
 0x45a   : > { %1700 = vperm.xlu0 %3383, %v2988_v23   ;;  %1542 = vrot.lane.b32.xlu1 %v1525_v26, %s3613_s13  ;;  %v3404_v23 = vunpack.i.h.bf16 %v3402_v8 }
 0x45b   : > { %1715 = vperm.xlu2 %3382, %v2991_v25  }
 0x462   : > { %1695 = vperm.xlu0 %3383, %v2987_v27   ;;  %1710 = vperm.xlu1 %3384, %v2990_v34   ;;  %v1624_v27 = vrot.slane %v3404_v23, 4 }
 0x463   : > { %1690 = vperm.xlu2 %3382, %v2986_v18  }
 0x46a   : > { %1960 = vperm.xlu0 %3383, %v3082_v35   ;;  %1705 = vperm.xlu1 %3384, %v2989_v36  }
 0x46b   : > { %1685 = vperm.xlu2 %3382, %v2985_v31  }
 0x472   : > { %1955 = vperm.xlu0 %3383, %v3081_v19   ;;  %1680 = vperm.xlu1 %3384, %v2984_v20  }
 0x473   : > { %1950 = vperm.xlu2 %3382, %v3080_v37  }
 0x47a   : > { %1965 = vperm.xlu1 %3384, %v3083_v22  }
 0x484   : > { %v1606_v29 = vpop.permute.xlu2 %1605 }
 0x485   : > { %v1621_v41 = vrot.slane %v1606_v29, 4 }
 0x487   : > { %v1629_v42 = vsel %vm393_vm0, %v1621_v41, %v1622_v17 }
 0x488   : > { %v1631_v43 = vsel %vm1630_vm7, %v1606_v29, %v1629_v42 }
 0x489   : > { %1642 = vst [vmem:[#allocation3 + $0x40] sm:$0xff] %v1631_v43 }
 0x494   : > { %v1614_v15 = vpop.permute.xlu2 %1613 }
 0x495   : > { %v1625_v45 = vrot.slane %v1614_v15, 4 }
 0x497   : > { %v1634_v46 = vsel %vm393_vm0, %v1625_v45, %v1626_v33  ;;  %v3042_v33 = vld [vmem:[#allocation3 + $0x40] sm:$0xf] }
 0x498   : > { %v1635_v47 = vsel %vm1630_vm7, %v1614_v15, %v1634_v46 }
 0x499   : > { %1644 = vst [vmem:[#allocation3 + $0x50] sm:$0xff] %v1635_v47  ;;  %v3291_v47 = vld [vmem:[#allocation3 + $0x44] sm:$0xf] }
 0x49d   : > { %v1549_v54 = vpop.permute.xlu2 %1548 }
 0x49e   : > { %v1560_v57 = vrot.slane %v1549_v54, 4 }
 0x4a0   : > { %v3050_v35 = vld [vmem:[#allocation3 + $0x50] sm:$0xf]  ;;  %v3293_v19 = vld [vmem:[#allocation3 + $0x54] sm:$0xf] }
 0x4a5   : > { %v1555_v58 = vpop.permute.xlu2 %1554 }
 0x4a6   : > { %v1563_v17 = vrot.slane %v1555_v58, 4  ;;  %v3026_v58 = vld [vmem:[#allocation3 + $0x20] sm:$0xf] }
 0x4ad   : > { %v1545_v22 = vpop.permute.xlu2 %1544 }
 0x4ae   : > { %v1558_v29 = vrot.slane %v1545_v22, 4 }
 0x4b4   : > { %v1551_v13 = vpop.permute.xlu0 %1550  ;;  %v1618_v44 = vpop.permute.xlu1 %1617 }
 0x4b5   : > { %v1561_v59 = vrot.slane %v1551_v13, 4  ;;  %v1627_v60 = vrot.slane %v1618_v44, 4 }
 0x4b7   : > { %v1569_v51 = vsel %vm393_vm0, %v1560_v57, %v1561_v59  ;;  %v1636_v52 = vsel %vm393_vm0, %v1627_v60, %v1628_v1  ;;  %v3039_v57 = vor.u32 %v3289_v55, %v3036_v5  ;;  %v3288_v59 = vld [vmem:[#allocation3 + $0x24] sm:$0xf0]  ;;  %v3028_v60 = vld [vmem:[#allocation3 + $0x28] sm:$0xf0] }
 0x4b8   : > { %v1637_v61 = vsel %vm1630_vm7, %v1618_v44, %v1636_v52  ;;  %v1570_v14 = vsel %vm1565_vm8, %v1549_v54, %v1569_v51  ;;  %v3034_v54 = vld [vmem:[#allocation3 + $0x30] sm:$0xf] }
 0x4b9   : > { %1645 = vst [vmem:[#allocation3 + $0x58] sm:$0xff] %v1637_v61  ;;  %v3035_v44 = vor.u32 %v3290_v4, %v3034_v54  ;;  %v3287_v61 = vld [vmem:[#allocation3 + $0x24] sm:$0xf] }
 0x4ba   : > { %1579 = vst [vmem:[#allocation3 + $0x10] sm:$0xff] %v1570_v14  ;;  %v3027_v14 = vor.u32 %v3288_v59, %v3026_v58  ;;  %v3031_v23 = vor.u32 %v3287_v61, %v3028_v60 }
 0x4bc   : > { %v1541_v25 = vpop.permute.xlu0 %1540  ;;  %v1610_v26 = vpop.permute.xlu1 %1609 }
 0x4bd   : > { %v1623_v34 = vrot.slane %v1610_v26, 4  ;;  %v1556_v1 = vrot.slane %v1541_v25, 4 }
 0x4bf   : > { %v1632_v18 = vsel %vm393_vm0, %v1623_v34, %v1624_v27 }
 0x4c0   : > { %v1633_v36 = vsel %vm1630_vm7, %v1610_v26, %v1632_v18  ;;  %v3294_v31 = vld [vmem:[#allocation3 + $0x54] sm:$0xf0]  ;;  %v3052_v20 = vld [vmem:[#allocation3 + $0x58] sm:$0xf0] }
 0x4c1   : > { %1643 = vst [vmem:[#allocation3 + $0x48] sm:$0xff] %v1633_v36  ;;  %v3051_v37 = vor.u32 %v3294_v31, %v3050_v35  ;;  %v3055_v38 = vor.u32 %v3293_v19, %v3052_v20  ;;  %v3018_v34 = vld [vmem:[#allocation3 + $0x10] sm:$0xf]  ;;  %v3285_v18 = vld [vmem:[#allocation3 + $0x14] sm:$0xf] }
 0x4c3   : > { %1822 = vmatpush.bf16.msra.mxu2 %v3051_v37  ;;  %1851 = vmatpush.bf16.msra.mxu3 %v3055_v38 }
 0x4c4   : > { %v1547_v8 = vpop.permute.xlu0 %1546  ;;  %v1553_v40 = vpop.permute.xlu1 %1552 }
 0x4c5   : > { %v1559_v41 = vrot.slane %v1547_v8, 4  ;;  %v1562_v42 = vrot.slane %v1553_v40, 4  ;;  %v3280_v8 = vld [vmem:[%s4393_s3 + $0x48] sm:$0xff] }
 0x4c7   : > { %v1567_v43 = vsel %vm393_vm0, %v1558_v29, %v1559_v41  ;;  %v1571_v28 = vsel %vm393_vm0, %v1562_v42, %v1563_v17  ;;  %v3282_v17 = vld [vmem:[%s4393_s3 + $0x58] sm:$0xff] }
 0x4c8   : > { %v1568_v15 = vsel %vm1565_vm8, %v1545_v22, %v1567_v43  ;;  %v1572_v45 = vsel %vm1565_vm8, %v1553_v40, %v1571_v28  ;;  %v3292_v46 = vld [vmem:[#allocation3 + $0x44] sm:$0xf0]  ;;  %v3044_v48 = vld [vmem:[#allocation3 + $0x48] sm:$0xf0]  ;;  %v3279_v22 = vld [vmem:[%s4393_s3 + $0x40] sm:$0xff] }
 0x4c9   : > { %1578 = vst [vmem:[#allocation3 + $0x8] sm:$0xff] %v1568_v15  ;;  %v3043_v49 = vor.u32 %v3292_v46, %v3042_v33  ;;  %v3047_v32 = vor.u32 %v3291_v47, %v3044_v48  ;;  %v3281_v40 = vld [vmem:[%s4393_s3 + $0x50] sm:$0xff]  ;;  %v3278_v47 = vld [vmem:[%s4395_s5 + $0x38] sm:$0xff] }
 0x4ca   : > { %1580 = vst [vmem:[#allocation3 + $0x18] sm:$0xff] %v1572_v45  ;;  %v3277_v28 = vld [vmem:[%s4395_s5 + $0x30] sm:$0xff] }
 0x4cb   : > { %1823 = vmatpush.bf16.msra.mxu2 %v3043_v49  ;;  %1852 = vmatpush.bf16.msra.mxu3 %v3047_v32 }
 0x4cc   : > { %v1543_v53 = vpop.permute.xlu1 %1542  ;;  %2970 = vmatmul.msk.bf16.gmra.mxu0 %vm835_vm4, %v3277_v28  ;;  %2974 = vmatmul.msk.bf16.gmra.mxu1 %vm835_vm4, %v3277_v28  ;;  %v1701_v59 = vpop.permute.xlu0 %1700 }
 0x4cd   : > { %v1557_v13 = vrot.slane %v1543_v53, 4  ;;  %v1716_v53 = vpop.permute.xlu2 %1715 }
 0x4cf   : > { %v1564_v51 = vsel %vm393_vm0, %v1556_v1, %v1557_v13  ;;  %1824 = vmatpush.bf16.msra.mxu2 %v3035_v44  ;;  %1853 = vmatpush.bf16.msra.mxu3 %v3039_v57 }
 0x4d0   : > { %v1566_v52 = vsel %vm1565_vm8, %v1541_v25, %v1564_v51  ;;  %v3284_v31 = vld [vmem:[#allocation3 + $0x4] sm:$0xf0]  ;;  %v3012_v37 = vld [vmem:[#allocation3 + $0x8] sm:$0xf0] }
 0x4d1   : > { %1577 = vst [vmem:[#allocation3] sm:$0xff] %v1566_v52  ;;  %v3286_v26 = vld [vmem:[#allocation3 + $0x14] sm:$0xf0]  ;;  %v3020_v27 = vld [vmem:[#allocation3 + $0x18] sm:$0xf0] }
 0x4d2   : > { %v3019_v35 = vor.u32 %v3286_v26, %v3018_v34  ;;  %v3023_v36 = vor.u32 %v3285_v18, %v3020_v27 }
 0x4d3   : > { %1825 = vmatpush.bf16.msra.mxu2 %v3027_v14  ;;  %1854 = vmatpush.bf16.msra.mxu3 %v3031_v23 }
 0x4d4   : > { %v1711_v32 = vpop.permute.xlu1 %1710 }
 0x4d5   : > { %v1691_v58 = vpop.permute.xlu2 %1690 }
 0x4d7   : > { %1826 = vmatpush.bf16.msra.mxu2 %v3019_v35  ;;  %1855 = vmatpush.bf16.msra.mxu3 %v3023_v36 }
 0x4d8   : > { %v3010_v19 = vld [vmem:[#allocation3] sm:$0xf]  ;;  %v3283_v20 = vld [vmem:[#allocation3 + $0x4] sm:$0xf] }
 0x4d9   : > { %v3011_v25 = vor.u32 %v3284_v31, %v3010_v19  ;;  %v3015_v38 = vor.u32 %v3283_v20, %v3012_v37 }
 0x4db   : > { %1827 = vmatpush.bf16.msra.mxu2 %v3011_v25  ;;  %1856 = vmatpush.bf16.msra.mxu3 %v3015_v38  ;;  %v1696_v25 = vpop.permute.xlu0 %1695 }
 0x4dc   : > { %2971 = vmatmul.msk.bf16.gmra.mxu0 %vm835_vm4, %v3278_v47  ;;  %2975 = vmatmul.msk.bf16.gmra.mxu1 %vm835_vm4, %v3278_v47  ;;  %v1706_v54 = vpop.permute.xlu1 %1705 }
 0x4de   : > { %3064 = vmatmul.msk.bf16.vlgmr.msra.gmra.mxu2 %vm636_vm3, %v3279_v22  ;;  %3068 = vmatmul.msk.bf16.vlgmr.msra.gmra.mxu3 %vm636_vm3, %v3279_v22 }
 0x4ee   : > { %3065 = vmatmul.msk.bf16.gmra.mxu2 %vm636_vm3, %v3280_v8  ;;  %3069 = vmatmul.msk.bf16.gmra.mxu3 %vm636_vm3, %v3280_v8 }
 0x4fe   : > { %3066 = vmatmul.msk.bf16.gmra.mxu2 %vm636_vm3, %v3281_v40  ;;  %3070 = vmatmul.msk.bf16.gmra.mxu3 %vm636_vm3, %v3281_v40 }
 0x50e   : > { %3067 = vmatmul.msk.bf16.gmra.mxu2 %vm636_vm3, %v3282_v17  ;;  %3071 = vmatmul.msk.bf16.gmra.mxu3 %vm636_vm3, %v3282_v17  ;;  %v1686_v17 = vpop.permute.xlu2 %1685 }
 0x561   : > { %v4110_v29 = vpop.f32.mrf.mxu2  ;;  %v4112_v41 = vpop.f32.mrf.mxu3 }
 0x569   : > { %v1831_v42 = vpop.f32.mrf.mxu2  ;;  %v1860_v43 = vpop.f32.mrf.mxu3 }
 0x571   : > { %v1834_v33 = vpop.f32.mrf.mxu2  ;;  %v1863_v15 = vpop.f32.mrf.mxu3 }
 0x572   : > { %v1835_v19 = vadd.f32 %v1834_v33, %v1691_v58  ;;  %v1864_v38 = vadd.f32 %v1863_v15, %v1691_v58 }
 0x579   : > { %v1836_v45 = vpop.f32.mrf.mxu2  ;;  %v1865_v46 = vpop.f32.mrf.mxu3 }
 0x57a   : > { %v1837_v8 = vadd.f32 %v1836_v45, %v1696_v25  ;;  %v1866_v28 = vadd.f32 %v1865_v46, %v1696_v25 }
 0x581   : > { %v1839_v48 = vpop.f32.mrf.mxu2  ;;  %v1868_v49 = vpop.f32.mrf.mxu3 }
 0x582   : > { %v1840_v51 = vadd.f32 %v1839_v48, %v1701_v59  ;;  %v1869_v61 = vadd.f32 %v1868_v49, %v1701_v59  ;;  %v1832_v48 = vadd.f32 %v1831_v42, %v1686_v17 }
 0x584   : > { %v1886_v27 = vmul.f32 0.5, %v1840_v51  ;;  %v1887_v34 = vmul.f32 0.5, %v1869_v61 }
 0x589   : > { %v1841_v4 = vpop.f32.mrf.mxu2  ;;  %v1870_v5 = vpop.f32.mrf.mxu3 }
 0x58a   : > { %v1842_v13 = vadd.f32 %v1841_v4, %v1706_v54  ;;  %v1871_v60 = vadd.f32 %v1870_v5, %v1706_v54  ;;  %v1861_v4 = vadd.f32 %v1860_v43, %v1686_v17 }
 0x58c   : > { %v1888_v23 = vmul.f32 0.5, %v1842_v13  ;;  %v1889_v26 = vmul.f32 0.5, %v1871_v60 }
 0x591   : > { %v1844_v55 = vpop.f32.mrf.mxu2  ;;  %v1873_v1 = vpop.f32.mrf.mxu3 }
 0x592   : > { %v1845_v44 = vadd.f32 %v1844_v55, %v1711_v32  ;;  %v1874_v57 = vadd.f32 %v1873_v1, %v1711_v32  ;;  %v1681_v32 = vpop.permute.xlu1 %1680 }
 0x593   : > { %v1859_v45 = vadd.f32 %v4112_v41, %v1681_v32 }
 0x594   : > { %v1890_v52 = vmul.f32 0.5, %v1845_v44  ;;  %v1891_v14 = vmul.f32 0.5, %v1874_v57 }
 0x596   : > { %3479 = vtanh.f32 %v1890_v52 }
 0x597   : > { %3481 = vtanh.f32 %v1891_v14 }
 0x598   : > { %3483 = vtanh.f32 %v1888_v23 }
 0x599   : > { %v1846_v18 = vpop.f32.mrf.mxu2  ;;  %v1875_v35 = vpop.f32.mrf.mxu3  ;;  %3485 = vtanh.f32 %v1889_v26 }
 0x59a   : > { %v1847_v36 = vadd.f32 %v1846_v18, %v1716_v53  ;;  %v1876_v31 = vadd.f32 %v1875_v35, %v1716_v53  ;;  %3487 = vtanh.f32 %v1886_v27  ;;  %v1830_v53 = vadd.f32 %v4110_v29, %v1681_v32  ;;  %v4136_v32 = vpop.f32.mrf.mxu0 }
 0x59b   : > { %3489 = vtanh.f32 %v1887_v34 }
 0x59c   : > { %v1892_v20 = vmul.f32 0.5, %v1847_v36  ;;  %v1893_v37 = vmul.f32 0.5, %v1876_v31  ;;  %v3480_v22 = vpop.eup %3479 }
 0x59d   : > { %v3482_v40 = vpop.eup %3481  ;;  %v1906_v33 = vmul.f32 0.5, %v3480_v22 }
 0x59e   : > { %3491 = vtanh.f32 %v1892_v20  ;;  %v3484_v47 = vpop.eup %3483  ;;  %v1907_v15 = vmul.f32 0.5, %v3482_v40 }
 0x59f   : > { %3493 = vtanh.f32 %v1893_v37  ;;  %v3486_v49 = vpop.eup %3485  ;;  %v1904_v55 = vmul.f32 0.5, %v3484_v47  ;;  %v1914_v44 = vadd.f32 0.5, %v1906_v33 }
 0x5a0   : > { %3495 = vtanh.f32 %v1835_v19  ;;  %v3488_v5 = vpop.eup %3487  ;;  %v1905_v1 = vmul.f32 0.5, %v3486_v49  ;;  %v1915_v60 = vadd.f32 0.5, %v1907_v15  ;;  %v3298_v49 = vld [vmem:[%s4395_s5 + $0x48] sm:$0xff] }
 0x5a1   : > { %3497 = vtanh.f32 %v1864_v38  ;;  %v3490_v54 = vpop.eup %3489  ;;  %v1902_v13 = vmul.f32 0.5, %v3488_v5  ;;  %v1912_v52 = vadd.f32 0.5, %v1904_v55 }
 0x5a2   : > { %3499 = vtanh.f32 %v1837_v8  ;;  %v1903_v59 = vmul.f32 0.5, %v3490_v54  ;;  %v1913_v61 = vadd.f32 0.5, %v1905_v1  ;;  %v4140_v33 = vpop.f32.mrf.mxu0  ;;  %v2180_v54 = vld [vmem:[#allocation2 + $0x2c] sm:$0xf] }
 0x5a3   : > { %3501 = vtanh.f32 %v1866_v28  ;;  %v1910_v26 = vadd.f32 0.5, %v1902_v13  ;;  %v2176_v1 = vld [vmem:[#allocation2 + $0xc] sm:$0xf] }
 0x5a4   : > { %v3492_v46 = vpop.eup %3491  ;;  %3503 = vtanh.f32 %v1832_v48  ;;  %v1911_v35 = vadd.f32 0.5, %v1903_v59  ;;  %v3297_v48 = vld [vmem:[%s4395_s5 + $0x40] sm:$0xff] }
 0x5a5   : > { %v3494_v42 = vpop.eup %3493  ;;  %3505 = vtanh.f32 %v1861_v4  ;;  %v1908_v43 = vmul.f32 0.5, %v3492_v46  ;;  %v4138_v4 = vpop.f32.mrf.mxu1 }
 0x5a6   : > { %v3496_v57 = vpop.eup %3495  ;;  %3507 = vtanh.f32 %v1830_v53  ;;  %v1909_v29 = vmul.f32 0.5, %v3494_v42  ;;  %v2178_v42 = vld [vmem:[#allocation2 + $0x1c] sm:$0xf] }
 0x5a7   : > { %v3498_v51 = vpop.eup %3497  ;;  %3509 = vtanh.f32 %v1859_v45  ;;  %v1916_v58 = vadd.f32 0.5, %v1908_v43  ;;  %v1922_v27 = vmul.f32 %v3496_v57, %v1914_v44  ;;  %v2182_v45 = vld [vmem:[#allocation2 + $0x3c] sm:$0xf]  ;;  %v3410_v44 = vpack.i.bf16 %v2178_v42, %v2176_v1  ;;  %v1961_v43 = vpop.permute.xlu0 %1960 }
 0x5a8   : > { %v3500_v41 = vpop.eup %3499  ;;  %v1917_v14 = vadd.f32 0.5, %v1909_v29  ;;  %v1923_v36 = vmul.f32 %v3498_v51, %v1915_v60  ;;  %v3405_v55 = vpack.i.bf16 %v2182_v45, %v2180_v54  ;;  %v1951_v57 = vpop.permute.xlu2 %1950 }
 0x5a9   : > { %v3502_v23 = vpop.eup %3501  ;;  %v1924_v34 = vmul.f32 %v3500_v41, %v1916_v58 }
 0x5aa   : > { %v3504_v18 = vpop.eup %3503  ;;  %v1925_v31 = vmul.f32 %v3502_v23, %v1917_v14  ;;  %v4144_v53 = vpop.f32.mrf.mxu0  ;;  %3406 = vrot.lane.b32.xlu2 %v3405_v55, %s3614_s8 }
 0x5ab   : > { %v3506_v19 = vpop.eup %3505  ;;  %v1920_v20 = vmul.f32 %v3504_v18, %v1912_v52  ;;  %v1928_v37 = vpack.c.bf16 %v1924_v34, %v1922_v27 }
 0x5ac   : > { %v3508_v25 = vpop.eup %3507  ;;  %v1921_v38 = vmul.f32 %v3506_v19, %v1913_v61  ;;  %v1929_v22 = vpack.c.bf16 %v1925_v31, %v1923_v36 }
 0x5ad   : > { %v3510_v8 = vpop.eup %3509  ;;  %v1918_v40 = vmul.f32 %v3508_v25, %v1910_v26  ;;  %2026 = vmatpush.bf16.msra.mxu0 %v1928_v37  ;;  %v4142_v5 = vpop.f32.mrf.mxu1 }
 0x5ae   : > { %v1919_v17 = vmul.f32 %v3510_v8, %v1911_v35  ;;  %2055 = vmatpush.bf16.msra.mxu1 %v1929_v22 }
 0x5af   : > { %v1926_v28 = vpack.c.bf16 %v1920_v20, %v1918_v40  ;;  %v1956_v14 = vpop.permute.xlu0 %1955  ;;  %v1966_v40 = vpop.permute.xlu1 %1965 }
 0x5b0   : > { %v1927_v47 = vpack.c.bf16 %v1921_v38, %v1919_v17  ;;  %v3299_v38 = vld [vmem:[%s4395_s5 + $0x50] sm:$0xff] }
 0x5b1   : > { %2027 = vmatpush.bf16.msra.mxu0 %v1926_v28 }
 0x5b2   : > { %2056 = vmatpush.bf16.msra.mxu1 %v1927_v47  ;;  %v4149_v46 = vpop.f32.mrf.mxu0  ;;  %3411 = vrot.lane.b32.xlu2 %v3410_v44, %s3614_s8 }
 0x5b4   : > { %3104 = vmatmul.msk.bf16.vlgmr.msra.gmra.mxu0 %vm835_vm4, %v3297_v48 }
 0x5b5   : > { %3108 = vmatmul.msk.bf16.vlgmr.msra.gmra.mxu1 %vm835_vm4, %v3297_v48  ;;  %v4146_v15 = vpop.f32.mrf.mxu1 }
 0x5bd   : > { %v4151_v13 = vpop.f32.mrf.mxu1 }
 0x5c4   : > { %3105 = vmatmul.msk.bf16.gmra.mxu0 %vm835_vm4, %v3298_v49 }
 0x5c5   : > { %3109 = vmatmul.msk.bf16.gmra.mxu1 %vm835_vm4, %v3298_v49 }
 0x5d4   : > { %3106 = vmatmul.msk.bf16.gmra.mxu0 %vm835_vm4, %v3299_v38 }
 0x5d5   : > { %3110 = vmatmul.msk.bf16.gmra.mxu1 %vm835_vm4, %v3299_v38  ;;  %v3215_v38 = vld [vmem:[%s4396_s6 + $0xd8] sm:$0xff] }
 0x631   : > { %v2029_v59 = vpop.f32.mrf.mxu0 }
 0x632   : > { %v2030_v60 = vadd.f32 %v2029_v59, %v1951_v57  ;;  %v2058_v29 = vpop.f32.mrf.mxu1  ;;  %v3300_v59 = vld [vmem:[%s4395_s5 + $0x58] sm:$0xff] }
 0x633   : > { %v2059_v51 = vadd.f32 %v2058_v29, %v1951_v57  ;;  %v3127_v29 = vld [vmem:[%s4394_s4 + $0xf8] sm:$0xff]  ;;  %3107 = vmatmul.msk.bf16.gmra.mxu0 %vm835_vm4, %v3300_v59  ;;  %3111 = vmatmul.msk.bf16.gmra.mxu1 %vm835_vm4, %v3300_v59 }
 0x634   : > { %v2078_v52 = vadd.f32 %v2030_v60, %v3997_v16  ;;  %v3124_v60 = vld [vmem:[%s4394_s4 + $0xe0] sm:$0xff] }
 0x635   : > { %v2079_v58 = vadd.f32 %v2059_v51, %v4000_v9 }
 0x636   : > { %v2086_v41 = vmul.f32 %v2078_v52, %v3833_v21  ;;  %v3123_v52 = vld [vmem:[%s4394_s4 + $0xd8] sm:$0xff] }
 0x637   : > { %v2087_v61 = vmul.f32 %v2079_v58, %v3835_v24  ;;  %v3126_v58 = vld [vmem:[%s4394_s4 + $0xf0] sm:$0xff] }
 0x639   : > { %v2094_v23 = vpack.c.bf16 %v2087_v61, %v2086_v41  ;;  %v2031_v26 = vpop.f32.mrf.mxu0  ;;  %v3122_v41 = vld [vmem:[%s4394_s4 + $0xd0] sm:$0xff]  ;;  %v771_v61 = vld [vmem:[%s4396_s6 + $0x20] sm:$0xff] }
 0x63a   : > { %v2032_v27 = vadd.f32 %v2031_v26, %v1956_v14  ;;  %v2060_v34 = vpop.f32.mrf.mxu1  ;;  %v774_v26 = vld [vmem:[%s4396_s6 + $0x38] sm:$0xff] }
 0x63b   : > { %2098 = vst [vmem:[#allocation2 + $0x4] sm:$0xff] %v2094_v23  ;;  %v2061_v18 = vadd.f32 %v2060_v34, %v1956_v14  ;;  %2191 = vrot.lane.b32.xlu1 %v2094_v23, %s3614_s8  ;;  %v3125_v14 = vld [vmem:[%s4394_s4 + $0xe8] sm:$0xff]  ;;  %v773_v34 = vld [vmem:[%s4396_s6 + $0x30] sm:$0xff] }
 0x63c   : > { %v2080_v35 = vadd.f32 %v2032_v27, %v4008_v30  ;;  %2171 = vst [vmem:[#allocation3 + $0x20] sm:$0xff] %v2094_v23  ;;  %v3121_v23 = vld [vmem:[%s4394_s4 + $0xc8] sm:$0xff]  ;;  %v3120_v27 = vld [vmem:[%s4394_s4 + $0xc0] sm:$0xff] }
 0x63d   : > { %v2081_v16 = vadd.f32 %v2061_v18, %v4011_v12  ;;  %v2950_v18 = vld [vmem:[%s4396_s6 + $0x70] sm:$0xff] }
 0x63e   : > { %v2088_v9 = vmul.f32 %v2080_v35, %v3833_v21  ;;  %v772_v35 = vld [vmem:[%s4396_s6 + $0x28] sm:$0xff] }
 0x63f   : > { %v2089_v36 = vmul.f32 %v2081_v16, %v3835_v24  ;;  %v2949_v16 = vld [vmem:[%s4396_s6 + $0x68] sm:$0xff] }
 0x641   : > { %v2095_v31 = vpack.c.bf16 %v2089_v36, %v2088_v9  ;;  %v2034_v19 = vpop.f32.mrf.mxu0  ;;  %v3085_v9 = vld [vmem:[%s4396_s6 + $0xa8] sm:$0xff]  ;;  %v2948_v36 = vld [vmem:[%s4396_s6 + $0x60] sm:$0xff] }
 0x642   : > { %v2035_v20 = vadd.f32 %v2034_v19, %v1961_v43  ;;  %v2063_v37 = vpop.f32.mrf.mxu1  ;;  %v2110_v44 = vld [vmem:[#allocation2] sm:$0xff]  ;;  %v2111_v51 = vld [vmem:[#allocation2 + $0x8] sm:$0xf] }
 0x643   : > { %2099 = vst [vmem:[#allocation2 + $0x14] sm:$0xff] %v2095_v31  ;;  %v2064_v25 = vadd.f32 %v2063_v37, %v1961_v43  ;;  %v3212_v19 = vld [vmem:[%s4396_s6 + $0xc0] sm:$0xff]  ;;  %v3087_v37 = vld [vmem:[%s4396_s6 + $0xb8] sm:$0xff] }
 0x644   : > { %v2082_v22 = vadd.f32 %v2035_v20, %v4018_v39  ;;  %2172 = vst [vmem:[#allocation3 + $0x28] sm:$0xff] %v2095_v31  ;;  %v2951_v20 = vld [vmem:[%s4396_s6 + $0x78] sm:$0xff] }
 0x645   : > { %v2083_v30 = vadd.f32 %v2064_v25, %v4021_v50  ;;  %v3407_v25 = vpop.permute.xlu2 %3406 }
 0x646   : > { %v2090_v12 = vmul.f32 %v2082_v22, %v3833_v21  ;;  %v3086_v22 = vld [vmem:[%s4396_s6 + $0xb0] sm:$0xff] }
 0x647   : > { %v2091_v8 = vmul.f32 %v2083_v30, %v3835_v24  ;;  %v3214_v30 = vld [vmem:[%s4396_s6 + $0xd0] sm:$0xff] }
 0x649   : > { %v2096_v17 = vpack.c.bf16 %v2091_v8, %v2090_v12  ;;  %v2036_v28 = vpop.f32.mrf.mxu0 }
 0x64a   : > { %v2037_v47 = vadd.f32 %v2036_v28, %v1966_v40  ;;  %v2065_v48 = vpop.f32.mrf.mxu1  ;;  %v2112_v57 = vld [vmem:[#allocation2 + $0x10] sm:$0xff] }
 0x64b   : > { %2100 = vst [vmem:[#allocation2 + $0x24] sm:$0xff] %v2096_v17  ;;  %v2066_v49 = vadd.f32 %v2065_v48, %v1966_v40  ;;  %2199 = vrot.lane.b32.xlu1 %v2096_v17, %s3614_s8  ;;  %v3213_v40 = vld [vmem:[%s4396_s6 + $0xc8] sm:$0xff]  ;;  %v3194_v48 = vld [vmem:[#allocation3 + $0x60] sm:$0xf] }
 0x64c   : > { %v2084_v39 = vadd.f32 %v2037_v47, %v4029_v2  ;;  %2173 = vst [vmem:[#allocation3 + $0x30] sm:$0xff] %v2096_v17  ;;  %v2113_v2 = vld [vmem:[#allocation2 + $0x18] sm:$0xf] }
 0x64d   : > { %v2085_v50 = vadd.f32 %v2066_v49, %v4032_v56  ;;  %v3412_v12 = vpop.permute.xlu2 %3411  ;;  %v3318_v49 = vld [vmem:[#allocation3 + $0x64] sm:$0xf0] }
 0x64e   : > { %v2092_v54 = vmul.f32 %v2084_v39, %v3833_v21  ;;  %v3413_v8 = vunpack.i.l.bf16 %v3412_v12  ;;  %v3195_v39 = vor.u32 %v3318_v49, %v3194_v48 }
 0x64f   : > { %v2093_v45 = vmul.f32 %v2085_v50, %v3835_v24  ;;  %v3317_v50 = vld [vmem:[#allocation3 + $0x64] sm:$0xf] }
 0x650   : > { %v2208_v17 = vrot.slane %v3413_v8, 4  ;;  %2407 = vmatpush.bf16.msrb.mxu2 %v3195_v39 }
 0x651   : > { %v2097_v55 = vpack.c.bf16 %v2093_v45, %v2092_v54  ;;  %v3196_v54 = vld [vmem:[#allocation3 + $0x68] sm:$0xf0] }
 0x652   : > { %v2115_v1 = vld [vmem:[#allocation2 + $0x28] sm:$0xf]  ;;  %v2114_v42 = vld [vmem:[#allocation2 + $0x20] sm:$0xff] }
 0x653   : > { %2101 = vst [vmem:[#allocation2 + $0x34] sm:$0xff] %v2097_v55  ;;  %2136 = vrot.lane.b32.xlu2 %v2115_v1, %s3615_s14  ;;  %2203 = vrot.lane.b32.xlu0 %v2097_v55, %s3614_s8 }
 0x654   : > { %2134 = vrot.lane.b32.xlu1 %v2114_v42, %s3615_s14  ;;  %2174 = vst [vmem:[#allocation3 + $0x38] sm:$0xff] %v2097_v55  ;;  %v3199_v55 = vor.u32 %v3317_v50, %v3196_v54  ;;  %v3408_v42 = vunpack.i.l.bf16 %v3407_v25 }
 0x656   : > { %2436 = vmatpush.bf16.msrb.mxu3 %v3199_v55 }
 0x65a   : > { %v2117_v43 = vld [vmem:[#allocation2 + $0x38] sm:$0xf]  ;;  %v2116_v56 = vld [vmem:[#allocation2 + $0x30] sm:$0xff] }
 0x65b   : > { %2126 = vrot.lane.b32.xlu2 %v2110_v44, %s3615_s14  ;;  %2195 = vrot.lane.b32.xlu0 %v2095_v31, %s3614_s8  ;;  %v3084_v31 = vld [vmem:[%s4396_s6 + $0xa0] sm:$0xff]  ;;  %v2212_v44 = vrot.slane %v3408_v42, 4 }
 0x65c   : > { %2140 = vrot.lane.b32.xlu1 %v2117_v43, %s3615_s14 }
 0x663   : > { %2132 = vrot.lane.b32.xlu2 %v2113_v2, %s3615_s14  ;;  %2138 = vrot.lane.b32.xlu0 %v2116_v56, %s3615_s14 }
 0x664   : > { %2130 = vrot.lane.b32.xlu1 %v2112_v57, %s3615_s14 }
 0x66b   : > { %2286 = vperm.xlu2 %3382, %v3124_v60   ;;  %2128 = vrot.lane.b32.xlu0 %v2111_v51, %s3615_s14  ;;  %v3409_v60 = vunpack.i.h.bf16 %v3407_v25  ;;  %s2625_s14 = scalar_lea.sflag [#allocation5], %s297_s21 }
 0x66c   : > { %2301 = vperm.xlu1 %3384, %v3127_v29  }
 0x66d   : > { %v2214_v51 = vrot.slane %v3409_v60, 4  ;;  %v3311_v60 = vld [vmem:[#allocation3 + $0x34] sm:$0xf] }
 0x673   : > { %2281 = vperm.xlu2 %3382, %v3123_v52   ;;  %2296 = vperm.xlu0 %3383, %v3126_v58  }
 0x674   : > { %2276 = vperm.xlu1 %3384, %v3122_v41  }
 0x67b   : > { %797 = vperm.xlu2 %3382, %v771_v61   ;;  %2291 = vperm.xlu0 %3383, %v3125_v14  }
 0x67c   : > { %2271 = vperm.xlu1 %3384, %v3121_v23  }
 0x683   : > { %812 = vperm.xlu2 %3382, %v774_v26   ;;  %2266 = vperm.xlu0 %3383, %v3120_v27   ;;  %v3414_v27 = vunpack.i.h.bf16 %v3412_v12 }
 0x684   : > { %807 = vperm.xlu1 %3384, %v773_v34  }
 0x68b   : > { %1394 = vperm.xlu2 %3382, %v2950_v18   ;;  %802 = vperm.xlu0 %3383, %v772_v35  }
 0x68c   : > { %1389 = vperm.xlu1 %3384, %v2949_v16   ;;  %v2210_v16 = vrot.slane %v3414_v27, 4  ;;  %v3309_v27 = vld [vmem:[#allocation3 + $0x24] sm:$0xf] }
 0x693   : > { %1975 = vperm.xlu2 %3382, %v3085_v9   ;;  %1384 = vperm.xlu0 %3383, %v2948_v36  }
 0x694   : > { %1970 = vperm.xlu1 %3384, %v3084_v31  }
 0x69b   : > { %2528 = vperm.xlu2 %3382, %v3212_v19   ;;  %1399 = vperm.xlu0 %3383, %v2951_v20  }
 0x69c   : > { %1985 = vperm.xlu1 %3384, %v3087_v37  }
 0x6a3   : > { %2543 = vperm.xlu2 %3382, %v3215_v38   ;;  %1980 = vperm.xlu0 %3383, %v3086_v22  }
 0x6a4   : > { %2538 = vperm.xlu1 %3384, %v3214_v30  }
 0x6ab   : > { %2533 = vperm.xlu0 %3383, %v3213_v40  }
 0x6ad   : > { %v2192_v28 = vpop.permute.xlu1 %2191  ;;  %v2137_v56 = vpop.permute.xlu2 %2136 }
 0x6ae   : > { %v2207_v47 = vrot.slane %v2192_v28, 4  ;;  %v2147_v41 = vrot.slane %v2137_v56, 4  ;;  %v3172_v56 = vld [vmem:[#allocation3 + $0x38] sm:$0xf0] }
 0x6b0   : > { %v2215_v45 = vsel %vm393_vm0, %v2207_v47, %v2208_v17 }
 0x6b1   : > { %v2217_v1 = vsel %vm2216_vm9, %v2192_v28, %v2215_v45 }
 0x6b2   : > { %2228 = vst [vmem:[#allocation3 + $0x40] sm:$0xff] %v2217_v1 }
 0x6b5   : > { %v2127_v34 = vpop.permute.xlu2 %2126 }
 0x6b9   : > { %v3178_v39 = vld [vmem:[#allocation3 + $0x40] sm:$0xf]  ;;  %v3313_v55 = vld [vmem:[#allocation3 + $0x44] sm:$0xf] }
 0x6bd   : > { %v2200_v43 = vpop.permute.xlu1 %2199  ;;  %v2133_v12 = vpop.permute.xlu2 %2132 }
 0x6be   : > { %v2211_v2 = vrot.slane %v2200_v43, 4  ;;  %v2145_v47 = vrot.slane %v2133_v12, 4  ;;  %v3301_v12 = vld [vmem:[%s4393_s3 + $0x60] sm:$0xff] }
 0x6c0   : > { %v2220_v57 = vsel %vm393_vm0, %v2211_v2, %v2212_v44  ;;  %v3312_v2 = vld [vmem:[#allocation3 + $0x34] sm:$0xf0] }
 0x6c1   : > { %v2221_v59 = vsel %vm2216_vm9, %v2200_v43, %v2220_v57 }
 0x6c2   : > { %2230 = vst [vmem:[#allocation3 + $0x50] sm:$0xff] %v2221_v59  ;;  %v3170_v59 = vld [vmem:[#allocation3 + $0x30] sm:$0xf] }
 0x6c5   : > { %v2204_v29 = vpop.permute.xlu0 %2203 }
 0x6c6   : > { %v2135_v52 = vpop.permute.xlu1 %2134  ;;  %v2213_v58 = vrot.slane %v2204_v29, 4 }
 0x6c7   : > { %v2146_v61 = vrot.slane %v2135_v52, 4 }
 0x6c8   : > { %v2222_v14 = vsel %vm393_vm0, %v2213_v58, %v2214_v51  ;;  %v3175_v58 = vor.u32 %v3311_v60, %v3172_v56 }
 0x6c9   : > { %v2155_v23 = vsel %vm393_vm0, %v2146_v61, %v2147_v41  ;;  %v2223_v26 = vsel %vm2216_vm9, %v2204_v29, %v2222_v14  ;;  %v3186_v19 = vld [vmem:[#allocation3 + $0x50] sm:$0xf]  ;;  %v3315_v25 = vld [vmem:[#allocation3 + $0x54] sm:$0xf]  ;;  %v2142_v29 = vrot.slane %v2127_v34, 4 }
 0x6ca   : > { %v2156_v18 = vsel %vm2151_vm10, %v2135_v52, %v2155_v23  ;;  %2231 = vst [vmem:[#allocation3 + $0x58] sm:$0xff] %v2223_v26  ;;  %v3171_v52 = vor.u32 %v3312_v2, %v3170_v59  ;;  %v3310_v41 = vld [vmem:[#allocation3 + $0x24] sm:$0xf0]  ;;  %v3164_v61 = vld [vmem:[#allocation3 + $0x28] sm:$0xf0] }
 0x6cb   : > { %2165 = vst [vmem:[#allocation3 + $0x10] sm:$0xff] %v2156_v18  ;;  %v3162_v26 = vld [vmem:[#allocation3 + $0x20] sm:$0xf] }
 0x6cc   : > { %v3163_v18 = vor.u32 %v3310_v41, %v3162_v26 }
 0x6cd   : > { %v2196_v35 = vpop.permute.xlu0 %2195 }
 0x6ce   : > { %v2141_v9 = vpop.permute.xlu1 %2140  ;;  %v2209_v36 = vrot.slane %v2196_v35, 4 }
 0x6cf   : > { %v2149_v40 = vrot.slane %v2141_v9, 4 }
 0x6d0   : > { %v2218_v31 = vsel %vm393_vm0, %v2209_v36, %v2210_v16 }
 0x6d1   : > { %v2219_v20 = vsel %vm2216_vm9, %v2196_v35, %v2218_v31  ;;  %v3316_v37 = vld [vmem:[#allocation3 + $0x54] sm:$0xf0]  ;;  %v3188_v38 = vld [vmem:[#allocation3 + $0x58] sm:$0xf0]  ;;  %v3167_v35 = vor.u32 %v3309_v27, %v3164_v61 }
 0x6d2   : > { %2229 = vst [vmem:[#allocation3 + $0x48] sm:$0xff] %v2219_v20  ;;  %v3187_v22 = vor.u32 %v3316_v37, %v3186_v19  ;;  %v3191_v30 = vor.u32 %v3315_v25, %v3188_v38  ;;  %v3154_v36 = vld [vmem:[#allocation3 + $0x10] sm:$0xf]  ;;  %v3307_v31 = vld [vmem:[#allocation3 + $0x14] sm:$0xf] }
 0x6d4   : > { %2408 = vmatpush.bf16.msrb.mxu2 %v3187_v22  ;;  %2437 = vmatpush.bf16.msrb.mxu3 %v3191_v30 }
 0x6d5   : > { %v2139_v8 = vpop.permute.xlu0 %2138 }
 0x6d6   : > { %v2131_v17 = vpop.permute.xlu1 %2130  ;;  %v2148_v28 = vrot.slane %v2139_v8, 4 }
 0x6d7   : > { %v2144_v48 = vrot.slane %v2131_v17, 4 }
 0x6d8   : > { %v2157_v49 = vsel %vm393_vm0, %v2148_v28, %v2149_v40  ;;  %v3303_v40 = vld [vmem:[%s4393_s3 + $0x70] sm:$0xff] }
 0x6d9   : > { %v2153_v50 = vsel %vm393_vm0, %v2144_v48, %v2145_v47  ;;  %v2158_v54 = vsel %vm2151_vm10, %v2139_v8, %v2157_v49  ;;  %v3314_v45 = vld [vmem:[#allocation3 + $0x44] sm:$0xf0]  ;;  %v3180_v1 = vld [vmem:[#allocation3 + $0x48] sm:$0xf0] }
 0x6da   : > { %v2154_v42 = vsel %vm2151_vm10, %v2131_v17, %v2153_v50  ;;  %2166 = vst [vmem:[#allocation3 + $0x18] sm:$0xff] %v2158_v54  ;;  %v3179_v44 = vor.u32 %v3314_v45, %v3178_v39  ;;  %v3183_v43 = vor.u32 %v3313_v55, %v3180_v1  ;;  %v3302_v8 = vld [vmem:[%s4393_s3 + $0x68] sm:$0xff]  ;;  %v3304_v17 = vld [vmem:[%s4393_s3 + $0x78] sm:$0xff] }
 0x6db   : > { %2164 = vst [vmem:[#allocation3 + $0x8] sm:$0xff] %v2154_v42 }
 0x6dc   : > { %2409 = vmatpush.bf16.msrb.mxu2 %v3179_v44  ;;  %2438 = vmatpush.bf16.msrb.mxu3 %v3183_v43 }
 0x6dd   : > { %v2129_v57 = vpop.permute.xlu0 %2128 }
 0x6de   : > { %v2143_v51 = vrot.slane %v2129_v57, 4  ;;  %v2302_v2 = vpop.permute.xlu1 %2301 }
 0x6e0   : > { %v2150_v14 = vsel %vm393_vm0, %v2142_v29, %v2143_v51  ;;  %2410 = vmatpush.bf16.msrb.mxu2 %v3171_v52  ;;  %2439 = vmatpush.bf16.msrb.mxu3 %v3175_v58  ;;  %v2287_v52 = vpop.permute.xlu2 %2286 }
 0x6e1   : > { %v2152_v23 = vsel %vm2151_vm10, %v2127_v34, %v2150_v14  ;;  %v3308_v16 = vld [vmem:[#allocation3 + $0x14] sm:$0xf0]  ;;  %v3156_v9 = vld [vmem:[#allocation3 + $0x18] sm:$0xf0] }
 0x6e2   : > { %2163 = vst [vmem:[#allocation3] sm:$0xff] %v2152_v23  ;;  %v3155_v19 = vor.u32 %v3308_v16, %v3154_v36  ;;  %v3159_v20 = vor.u32 %v3307_v31, %v3156_v9  ;;  %v3306_v37 = vld [vmem:[#allocation3 + $0x4] sm:$0xf0]  ;;  %v3148_v22 = vld [vmem:[#allocation3 + $0x8] sm:$0xf0] }
 0x6e4   : > { %2411 = vmatpush.bf16.msrb.mxu2 %v3163_v18  ;;  %2440 = vmatpush.bf16.msrb.mxu3 %v3167_v35 }
 0x6e5   : > { %v2297_v42 = vpop.permute.xlu0 %2296 }
 0x6e6   : > { %v2277_v14 = vpop.permute.xlu1 %2276 }
 0x6e8   : > { %2412 = vmatpush.bf16.msrb.mxu2 %v3155_v19  ;;  %2441 = vmatpush.bf16.msrb.mxu3 %v3159_v20 }
 0x6e9   : > { %v3146_v25 = vld [vmem:[#allocation3] sm:$0xf]  ;;  %v3305_v38 = vld [vmem:[#allocation3 + $0x4] sm:$0xf] }
 0x6ea   : > { %v3147_v34 = vor.u32 %v3306_v37, %v3146_v25  ;;  %v3151_v30 = vor.u32 %v3305_v38, %v3148_v22  ;;  %v2282_v38 = vpop.permute.xlu2 %2281 }
 0x6ec   : > { %2413 = vmatpush.bf16.msrb.mxu2 %v3147_v34  ;;  %2442 = vmatpush.bf16.msrb.mxu3 %v3151_v30 }
 0x6ed   : > { %v2292_v56 = vpop.permute.xlu0 %2291 }
 0x6ef   : > { %3200 = vmatmul.msk.bf16.vlgmr.msrb.gmra.mxu2 %vm636_vm3, %v3301_v12  ;;  %3204 = vmatmul.msk.bf16.vlgmr.msrb.gmra.mxu3 %vm636_vm3, %v3301_v12 }
 0x6ff   : > { %3201 = vmatmul.msk.bf16.gmra.mxu2 %vm636_vm3, %v3302_v8  ;;  %3205 = vmatmul.msk.bf16.gmra.mxu3 %vm636_vm3, %v3302_v8  ;;  %v2272_v8 = vpop.permute.xlu1 %2271 }
 0x70f   : > { %3202 = vmatmul.msk.bf16.gmra.mxu2 %vm636_vm3, %v3303_v40  ;;  %3206 = vmatmul.msk.bf16.gmra.mxu3 %vm636_vm3, %v3303_v40 }
 0x71f   : > { %3203 = vmatmul.msk.bf16.gmra.mxu2 %vm636_vm3, %v3304_v17  ;;  %3207 = vmatmul.msk.bf16.gmra.mxu3 %vm636_vm3, %v3304_v17 }
 0x772   : > { %v2415_v28 = vpop.f32.mrf.mxu2  ;;  %v4292_v47 = vpop.f32.mrf.mxu3 }
 0x77a   : > { %v2417_v48 = vpop.f32.mrf.mxu2  ;;  %v2446_v49 = vpop.f32.mrf.mxu3 }
 0x782   : > { %v2420_v39 = vpop.f32.mrf.mxu2  ;;  %v2449_v50 = vpop.f32.mrf.mxu3 }
 0x783   : > { %v2421_v20 = vadd.f32 %v2420_v39, %v2277_v14  ;;  %v2450_v22 = vadd.f32 %v2449_v50, %v2277_v14 }
 0x78a   : > { %v2422_v54 = vpop.f32.mrf.mxu2  ;;  %v2451_v45 = vpop.f32.mrf.mxu3 }
 0x78b   : > { %v2423_v30 = vadd.f32 %v2422_v54, %v2282_v38  ;;  %v2452_v40 = vadd.f32 %v2451_v45, %v2282_v38 }
 0x792   : > { %v2425_v55 = vpop.f32.mrf.mxu2  ;;  %v2454_v1 = vpop.f32.mrf.mxu3 }
 0x793   : > { %v2426_v41 = vadd.f32 %v2425_v55, %v2287_v52  ;;  %v2455_v23 = vadd.f32 %v2454_v1, %v2287_v52  ;;  %v2418_v55 = vadd.f32 %v2417_v48, %v2272_v8 }
 0x795   : > { %v2472_v35 = vmul.f32 0.5, %v2426_v41  ;;  %v2473_v16 = vmul.f32 0.5, %v2455_v23 }
 0x79a   : > { %v2427_v44 = vpop.f32.mrf.mxu2  ;;  %v2456_v43 = vpop.f32.mrf.mxu3 }
 0x79b   : > { %v2428_v60 = vadd.f32 %v2427_v44, %v2292_v56  ;;  %v2457_v58 = vadd.f32 %v2456_v43, %v2292_v56  ;;  %v2447_v44 = vadd.f32 %v2446_v49, %v2272_v8 }
 0x79d   : > { %v2474_v27 = vmul.f32 0.5, %v2428_v60  ;;  %v2475_v18 = vmul.f32 0.5, %v2457_v58 }
 0x7a2   : > { %v2430_v57 = vpop.f32.mrf.mxu2  ;;  %v2459_v59 = vpop.f32.mrf.mxu3 }
 0x7a3   : > { %v2431_v29 = vadd.f32 %v2430_v57, %v2297_v42  ;;  %v2460_v51 = vadd.f32 %v2459_v59, %v2297_v42  ;;  %v2267_v42 = vpop.permute.xlu0 %2266 }
 0x7a4   : > { %v2445_v54 = vadd.f32 %v4292_v47, %v2267_v42 }
 0x7a5   : > { %v2476_v61 = vmul.f32 0.5, %v2431_v29  ;;  %v2477_v26 = vmul.f32 0.5, %v2460_v51 }
 0x7a7   : > { %3511 = vtanh.f32 %v2476_v61 }
 0x7a8   : > { %3513 = vtanh.f32 %v2477_v26 }
 0x7a9   : > { %3515 = vtanh.f32 %v2474_v27 }
 0x7aa   : > { %v2432_v9 = vpop.f32.mrf.mxu2  ;;  %v2461_v36 = vpop.f32.mrf.mxu3  ;;  %3517 = vtanh.f32 %v2475_v18 }
 0x7ab   : > { %v2433_v31 = vadd.f32 %v2432_v9, %v2302_v2  ;;  %v2462_v19 = vadd.f32 %v2461_v36, %v2302_v2  ;;  %3519 = vtanh.f32 %v2472_v35  ;;  %v2416_v2 = vadd.f32 %v2415_v28, %v2267_v42  ;;  %v798_v42 = vpop.permute.xlu2 %797 }
 0x7ac   : > { %3521 = vtanh.f32 %v2473_v16 }
 0x7ad   : > { %v2478_v37 = vmul.f32 0.5, %v2433_v31  ;;  %v2479_v25 = vmul.f32 0.5, %v2462_v19  ;;  %v3512_v34 = vpop.eup %3511 }
 0x7ae   : > { %v3514_v12 = vpop.eup %3513  ;;  %v2492_v39 = vmul.f32 0.5, %v3512_v34 }
 0x7af   : > { %3523 = vtanh.f32 %v2478_v37  ;;  %v3516_v17 = vpop.eup %3515  ;;  %v2493_v50 = vmul.f32 0.5, %v3514_v12 }
 0x7b0   : > { %3525 = vtanh.f32 %v2479_v25  ;;  %v3518_v1 = vpop.eup %3517  ;;  %v2490_v57 = vmul.f32 0.5, %v3516_v17  ;;  %v2500_v29 = vadd.f32 0.5, %v2492_v39  ;;  %v2068_v39 = vpop.f32.mrf.mxu1 }
 0x7b1   : > { %3527 = vtanh.f32 %v2421_v20  ;;  %v3520_v43 = vpop.eup %3519  ;;  %v2491_v45 = vmul.f32 0.5, %v3518_v1  ;;  %v2501_v58 = vadd.f32 0.5, %v2493_v50  ;;  %v3320_v1 = vld [vmem:[%s4395_s5 + $0x68] sm:$0xff] }
 0x7b2   : > { %3529 = vtanh.f32 %v2450_v22  ;;  %v3522_v56 = vpop.eup %3521  ;;  %v2488_v48 = vmul.f32 0.5, %v3520_v43  ;;  %v2498_v61 = vadd.f32 0.5, %v2490_v57  ;;  %v803_v43 = vpop.permute.xlu0 %802 }
 0x7b3   : > { %3531 = vtanh.f32 %v2423_v30  ;;  %v2489_v52 = vmul.f32 0.5, %v3522_v56  ;;  %v2499_v23 = vadd.f32 0.5, %v2491_v45 }
 0x7b4   : > { %3533 = vtanh.f32 %v2452_v40  ;;  %v2496_v18 = vadd.f32 0.5, %v2488_v48 }
 0x7b5   : > { %v3524_v59 = vpop.eup %3523  ;;  %3535 = vtanh.f32 %v2418_v55  ;;  %v2497_v36 = vadd.f32 0.5, %v2489_v52  ;;  %v3319_v55 = vld [vmem:[%s4395_s5 + $0x60] sm:$0xff] }
 0x7b6   : > { %v3526_v60 = vpop.eup %3525  ;;  %3537 = vtanh.f32 %v2447_v44  ;;  %v2494_v51 = vmul.f32 0.5, %v3524_v59  ;;  %v2039_v44 = vpop.f32.mrf.mxu0 }
 0x7b7   : > { %v3528_v49 = vpop.eup %3527  ;;  %3539 = vtanh.f32 %v2416_v2  ;;  %v2495_v28 = vmul.f32 0.5, %v3526_v60  ;;  %v4305_v2 = vpop.permute.xlu2 %812 }
 0x7b8   : > { %v3530_v41 = vpop.eup %3529  ;;  %3541 = vtanh.f32 %v2445_v54  ;;  %v2502_v14 = vadd.f32 0.5, %v2494_v51  ;;  %v2508_v35 = vmul.f32 %v3528_v49, %v2500_v29  ;;  %v2070_v56 = vpop.f32.mrf.mxu1 }
 0x7b9   : > { %v3532_v47 = vpop.eup %3531  ;;  %v2503_v26 = vadd.f32 0.5, %v2495_v28  ;;  %v2509_v31 = vmul.f32 %v3530_v41, %v2501_v58  ;;  %v808_v54 = vpop.permute.xlu1 %807  ;;  %v868_v41 = vadd.f32 %v3963_v62, %v798_v42 }
 0x7ba   : > { %v3534_v27 = vpop.eup %3533  ;;  %v2510_v16 = vmul.f32 %v3532_v47, %v2502_v14  ;;  %v1385_v57 = vpop.permute.xlu0 %1384 }
 0x7bb   : > { %v3536_v9 = vpop.eup %3535  ;;  %v2511_v19 = vmul.f32 %v3534_v27, %v2503_v26  ;;  %v1454_v52 = vadd.f32 %v4136_v32, %v1385_v57  ;;  %v1483_v28 = vadd.f32 %v4138_v4, %v1385_v57 }
 0x7bc   : > { %v3538_v20 = vpop.eup %3537  ;;  %v2506_v37 = vmul.f32 %v3536_v9, %v2498_v61  ;;  %v2514_v25 = vpack.c.bf16 %v2510_v16, %v2508_v35  ;;  %v897_v61 = vadd.f32 %v3965_v63, %v798_v42  ;;  %v870_v9 = vadd.f32 %v3967_v0, %v803_v43 }
 0x7bd   : > { %v3540_v38 = vpop.eup %3539  ;;  %v2507_v22 = vmul.f32 %v3538_v20, %v2499_v23  ;;  %v2515_v34 = vpack.c.bf16 %v2511_v19, %v2509_v31  ;;  %v1516_v47 = vadd.f32 %v1454_v52, %v868_v41  ;;  %v899_v31 = vadd.f32 %v3969_v3, %v803_v43 }
 0x7be   : > { %v3542_v30 = vpop.eup %3541  ;;  %v2504_v12 = vmul.f32 %v3540_v38, %v2496_v18  ;;  %2568 = vmatpush.bf16.msrb.mxu0 %v2514_v25  ;;  %v2041_v50 = vpop.f32.mrf.mxu0  ;;  %v1517_v23 = vadd.f32 %v1483_v28, %v897_v61  ;;  %v873_v42 = vadd.f32 %v3971_v6, %v808_v54 }
 0x7bf   : > { %v2505_v8 = vmul.f32 %v3542_v30, %v2497_v36  ;;  %2587 = vmatpush.bf16.msrb.mxu1 %v2515_v34  ;;  %v1395_v59 = vpop.permute.xlu2 %1394 }
 0x7c0   : > { %v2512_v40 = vpack.c.bf16 %v2506_v37, %v2504_v12  ;;  %v2073_v60 = vpop.f32.mrf.mxu1 }
 0x7c1   : > { %v2513_v17 = vpack.c.bf16 %v2507_v22, %v2505_v8  ;;  %v1390_v48 = vpop.permute.xlu1 %1389 }
 0x7c2   : > { %2569 = vmatpush.bf16.msrb.mxu0 %v2512_v40  ;;  %v4307_v29 = vpop.permute.xlu0 %1399  ;;  %v1456_v32 = vadd.f32 %v4140_v33, %v1390_v48  ;;  %v1485_v63 = vadd.f32 %v4142_v5, %v1390_v48  ;;  %v1488_v48 = vadd.f32 %v4146_v15, %v1395_v59 }
 0x7c3   : > { %2588 = vmatpush.bf16.msrb.mxu1 %v2513_v17  ;;  %v1490_v15 = vadd.f32 %v4151_v13, %v4307_v29 }
 0x7c4   : > { %v1518_v38 = vadd.f32 %v1456_v32, %v870_v9  ;;  %v1519_v34 = vadd.f32 %v1485_v63, %v899_v31 }
 0x7c5   : > { %3224 = vmatmul.msk.bf16.vlgmr.msrb.gmra.mxu0 %vm835_vm4, %v3319_v55 }
 0x7c6   : > { %3226 = vmatmul.msk.bf16.vlgmr.msrb.gmra.mxu1 %vm835_vm4, %v3319_v55  ;;  %v2044_v45 = vpop.f32.mrf.mxu0 }
 0x7c7   : > { %v1976_v51 = vpop.permute.xlu2 %1975 }
 0x7c8   : > { %v4312_v58 = vpop.f32.mrf.mxu1  ;;  %v2042_v30 = vadd.f32 %v2041_v50, %v1976_v51  ;;  %v2071_v5 = vadd.f32 %v2070_v56, %v1976_v51  ;;  %v1459_v50 = vadd.f32 %v4144_v53, %v1395_v59 }
 0x7c9   : > { %v1971_v14 = vpop.permute.xlu1 %1970 }
 0x7ca   : > { %v1981_v26 = vpop.permute.xlu0 %1980  ;;  %v2040_v27 = vadd.f32 %v2039_v44, %v1971_v14  ;;  %v2069_v35 = vadd.f32 %v2068_v39, %v1971_v14  ;;  %v2104_v8 = vadd.f32 %v2042_v30, %v1518_v38  ;;  %v2105_v55 = vadd.f32 %v2071_v5, %v1519_v34 }
 0x7cb   : > { %v902_v39 = vadd.f32 %v3973_v7, %v808_v54  ;;  %v2045_v57 = vadd.f32 %v2044_v45, %v1981_v26  ;;  %v2074_v51 = vadd.f32 %v2073_v60, %v1981_v26  ;;  %v1520_v28 = vadd.f32 %v1459_v50, %v873_v42 }
 0x7cc   : > { %v2102_v4 = vadd.f32 %v2040_v27, %v1516_v47  ;;  %v2103_v19 = vadd.f32 %v2069_v35, %v1517_v23  ;;  %v1461_v7 = vadd.f32 %v4149_v46, %v4307_v29  ;;  %v875_v14 = vadd.f32 %v3975_v10, %v4305_v2 }
 0x7cd   : > { %v1521_v41 = vadd.f32 %v1488_v48, %v902_v39  ;;  %v2106_v54 = vadd.f32 %v2045_v57, %v1520_v28  ;;  %v904_v23 = vadd.f32 %v3977_v11, %v4305_v2 }
 0x7ce   : > { %v4309_v49 = vpop.f32.mrf.mxu0  ;;  %v1522_v46 = vadd.f32 %v1461_v7, %v875_v14 }
 0x7cf   : > { %v2529_v18 = vpop.permute.xlu2 %2528  ;;  %v2107_v59 = vadd.f32 %v2074_v51, %v1521_v41 }
 0x7d1   : > { %v1986_v33 = vpop.permute.xlu1 %1985 }
 0x7d2   : > { %v2534_v12 = vpop.permute.xlu0 %2533  ;;  %v2047_v13 = vadd.f32 %v4309_v49, %v1986_v33  ;;  %v2076_v29 = vadd.f32 %v4312_v58, %v1986_v33 }
 0x7d4   : > { %v2108_v2 = vadd.f32 %v2047_v13, %v1522_v46 }
 0x7d5   : > { %3225 = vmatmul.msk.bf16.gmra.mxu0 %vm835_vm4, %v3320_v1 }
 0x7d6   : > { %3227 = vmatmul.msk.bf16.gmra.mxu1 %vm835_vm4, %v3320_v1 }
 0x7d7   : > { %v2544_v10 = vpop.permute.xlu2 %2543 }
 0x7d9   : > { %v2539_v61 = vpop.permute.xlu1 %2538 }
 0x842   : > { %v2571_v16 = vpop.f32.mrf.mxu0 }
 0x843   : > { %v2572_v36 = vadd.f32 %v2571_v16, %v2529_v18  ;;  %v2590_v62 = vpop.f32.mrf.mxu1 }
 0x844   : > { %v2591_v20 = vadd.f32 %v2590_v62, %v2529_v18  ;;  %v1523_v18 = vadd.f32 %v1490_v15, %v904_v23 }
 0x845   : > { %v2600_v37 = vadd.f32 %v2572_v36, %v2102_v4 }
 0x846   : > { %v2601_v25 = vadd.f32 %v2591_v20, %v2103_v19  ;;  %v2109_v9 = vadd.f32 %v2076_v29, %v1523_v18 }
 0x847   : > { %v2608_v22 = vmul.f32 %v2600_v37, %v3833_v21 }
 0x848   : > { %v2609_v0 = vmul.f32 %v2601_v25, %v3835_v24 }
 0x849   : > { %2616 = vst [vmem:[%s4326_s23] sm:$0xff] %v2608_v22 }
 0x84a   : > { %2617 = vst [vmem:[%s4326_s23 + $0x8] sm:$0xff] %v2609_v0  ;;  %v2573_v3 = vpop.f32.mrf.mxu0 }
 0x84b   : > { %v2574_v40 = vadd.f32 %v2573_v3, %v2534_v12  ;;  %v2592_v17 = vpop.f32.mrf.mxu1 }
 0x84c   : > { %v2593_v1 = vadd.f32 %v2592_v17, %v2534_v12 }
 0x84d   : > { %v2602_v44 = vadd.f32 %v2574_v40, %v2104_v8 }
 0x84e   : > { %v2603_v43 = vadd.f32 %v2593_v1, %v2105_v55 }
 0x84f   : > { %v2610_v56 = vmul.f32 %v2602_v44, %v3833_v21 }
 0x850   : > { %v2611_v52 = vmul.f32 %v2603_v43, %v3835_v24 }
 0x851   : > { %2618 = vst [vmem:[%s4326_s23 + $0x10] sm:$0xff] %v2610_v56 }
 0x852   : > { %2619 = vst [vmem:[%s4326_s23 + $0x18] sm:$0xff] %v2611_v52  ;;  %v2576_v6 = vpop.f32.mrf.mxu0 }
 0x853   : > { %v2577_v53 = vadd.f32 %v2576_v6, %v2539_v61  ;;  %v2595_v45 = vpop.f32.mrf.mxu1 }
 0x854   : > { %v2596_v60 = vadd.f32 %v2595_v45, %v2539_v61 }
 0x855   : > { %v2604_v47 = vadd.f32 %v2577_v53, %v2106_v54 }
 0x856   : > { %v2605_v26 = vadd.f32 %v2596_v60, %v2107_v59 }
 0x857   : > { %v2612_v27 = vmul.f32 %v2604_v47, %v3833_v21 }
 0x858   : > { %v2613_v35 = vmul.f32 %v2605_v26, %v3835_v24 }
 0x859   : > { %2620 = vst [vmem:[%s4326_s23 + $0x20] sm:$0xff] %v2612_v27 }
 0x85a   : > { %2621 = vst [vmem:[%s4326_s23 + $0x28] sm:$0xff] %v2613_v35  ;;  %v2578_v11 = vpop.f32.mrf.mxu0 }
 0x85b   : > { %v2579_v16 = vadd.f32 %v2578_v11, %v2544_v10  ;;  %v2597_v32 = vpop.f32.mrf.mxu1 }
 0x85c   : > { %v2598_v4 = vadd.f32 %v2597_v32, %v2544_v10 }
 0x85d   : > { %v2606_v49 = vadd.f32 %v2579_v16, %v2108_v2 }
 0x85e   : > { %v2607_v36 = vadd.f32 %v2598_v4, %v2109_v9 }
 0x85f   : > { %v2614_v62 = vmul.f32 %v2606_v49, %v3833_v21 }
 0x860   : > { %v2615_v58 = vmul.f32 %v2607_v36, %v3835_v24 }
 0x861   : > { %2622 = vst [vmem:[%s4326_s23 + $0x30] sm:$0xff] %v2614_v62 }
 0x862   : > { %2623 = vst [vmem:[%s4326_s23 + $0x38] sm:$0xff] %v2615_v58 }
 0x863   : > { %3570 = shalt.err (!%p3567_p3)
}
 0x864   : > { %s3616_s21 = smov 256   ;;  %s3617_s23 = smov 16  }
 0x865   : > { %3322 = dma.vmem_to_hbm [thread:$0]  (%p3696_p5), %s2638_s28, 1024, %s2640_s15, %s2625_s14, %s3616_s21, %s3616_s21, %s3617_s23  }
 0x866 PF: > { %p3328_p4 = scmp.ge.s32.totalorder %s3605_s27, 2  ;;  %s2654_s8 = sand.u32 1, %s3593_s24  }
 0x867   : > { %s2655_s13 = scalar_lea.sflag [#allocation5], %s2654_s8 }
 0x868   : > { %p3325_p7 = pnand %p3328_p4, %p3700_p6 }
 0x86a   : > { %p3326_p8 = pneg %p3325_p7 }
 0x86c   : > { %3588 = dma.done.wait (%p3326_p8), %s2655_s13, 1024  }
 0x86d   : > { %3590 = vsyncadd (%p3326_p8), %s2655_s13, 4294966272  ;;  %p17_p9 = scmp.ge.s32.totalorder %s3683_s30, 4   ;;  %s4400_s24 = smov %s3597_s25 }
 0x86e   : > { %s4401_s25 = smov %s3601_s26  ;;  %s4402_s26 = smov %s3694_s10 }
 0x86f   : > { %s4403_s27 = smov %s3683_s30  ;;  %19 = sbr.rel (!%p17_p9) target bundleno = 3 (0x3), region = 101 }
 0x874   :  { %2661 = vsyncpa [#allocation5], 1 }
 0x875   :  { %2663 = vsyncpa [#allocation5 + $0x1], 1 }

</bundles_post_ra>
